<compile_context>
chip_gen: v7x
topology: tpu7x:2x2x1
jax: 0.10.0
libtpu: 0.0.40
codegen_flags: <defaults>
</compile_context>

<pallas_src>
import functools

import jax
import jax.numpy as jnp
from jax.experimental import pallas as pl
from jax.experimental.pallas import tpu as pltpu


LANE = 128


def _round_up(n, m):
    return ((n + m - 1) // m) * m


# ------------------------------ Pallas kernel --------------------------------

def _effnet_fused_kernel(x_ref, wconv_ref, bconv_ref, whead_ref, bhead_ref,
                         logits_ref, probs_ref, pred_ref, *, inv_hw):
    """Per-image fused: 3x3 'same' conv + SiLU + global-avg-pool + Linear
    classifier + softmax(dim=1) + argmax(dim=1).

    x_ref:      [1, H+2, W+2, C]  bf16  zero-padded NHWC image (one per step)
    wconv_ref:  [9*C, OC_pad]     bf16  im2col-packed conv weight
    bconv_ref:  [1, OC_pad]       f32   conv bias (zero-padded)
    whead_ref:  [OC_pad, NC_pad]  bf16  classifier weight (transposed, padded)
    bhead_ref:  [1, NC_pad]       f32   classifier bias (-1e30 in padded slots)
    logits_ref: [1, 1, NC_pad]    f32
    probs_ref:  [1, 1, NC_pad]    f32
    pred_ref:   [1, 1, 1]         i32
    """
    xp = x_ref[0]                               # [H+2, W+2, C] bf16
    hp2, wp2, c = xp.shape
    h, w = hp2 - 2, wp2 - 2
    ocp = wconv_ref.shape[1]
    ncp = whead_ref.shape[1]

    # im2col in VMEM: concatenate the 9 shifted taps along the channel (lane)
    # axis -> one [h*w, 9*C] LHS and a single MXU matmul (f32 accumulation).
    taps = [xp[di:di + h, dj:dj + w, :] for di in range(3) for dj in range(3)]
    lhs = jnp.concatenate(taps, axis=-1).reshape(h * w, 9 * c)

    pre = jnp.dot(lhs, wconv_ref[...], preferred_element_type=jnp.float32)
    pre = pre + bconv_ref[...]                                  # [h*w, OC_pad]

    # SiLU; the reciprocal goes to the otherwise-idle EUP slot.
    act = pre * pl.reciprocal(1.0 + jnp.exp(-pre), approx=True)

    # avgpool + flatten fused: pooled feature vector never hits HBM.
    pooled = (jnp.sum(act, axis=0) * inv_hw).reshape(1, ocp)

    # classifier (Dropout = identity at inference) fused into the same step.
    logits = jnp.dot(pooled.astype(jnp.bfloat16), whead_ref[...],
                     preferred_element_type=jnp.float32) + bhead_ref[...]
    logits_ref[0] = logits

    # softmax(dim=1)
    row_max = jnp.max(logits, axis=1, keepdims=True)
    e = jnp.exp(logits - row_max)
    denom = jnp.sum(e, axis=1, keepdims=True)
    probs_ref[0] = e * pl.reciprocal(denom, approx=True)

    # argmax(dim=1), first occurrence; padded classes carry a -1e30 bias so
    # they never win.
    col = jax.lax.broadcasted_iota(jnp.int32, (1, ncp), 1)
    masked = jnp.where(logits == row_max, col, jnp.int32(ncp))
    pred_ref[0] = jnp.min(masked, axis=1, keepdims=True)


# -------------------------------- wrapper -------------------------------------

def effnet_forward(x_pad, w_conv, b_conv, w_head, b_head, *, hw_total):
    """x_pad: [B, H+2, W+2, C] bf16 -> (logits [B,NCp], probs [B,NCp], pred [B])."""
    B, Hp2, Wp2, C = x_pad.shape
    KC, OCp = w_conv.shape
    NCp = w_head.shape[1]
    kernel = functools.partial(_effnet_fused_kernel, inv_hw=1.0 / float(hw_total))

    logits, probs, pred = pl.pallas_call(
        kernel,
        out_shape=(
            jax.ShapeDtypeStruct((B, 1, NCp), jnp.float32),   # logits (padded)
            jax.ShapeDtypeStruct((B, 1, NCp), jnp.float32),   # softmax probs
            jax.ShapeDtypeStruct((B, 1, 1), jnp.int32),       # argmax class
        ),
        grid_spec=pltpu.PrefetchScalarGridSpec(
            num_scalar_prefetch=0,
            grid=(B,),
            in_specs=[
                pl.BlockSpec((1, Hp2, Wp2, C), lambda b: (b, 0, 0, 0)),
                pl.BlockSpec((KC, OCp), lambda b: (0, 0)),
                pl.BlockSpec((1, OCp), lambda b: (0, 0)),
                pl.BlockSpec((OCp, NCp), lambda b: (0, 0)),
                pl.BlockSpec((1, NCp), lambda b: (0, 0)),
            ],
            out_specs=(
                pl.BlockSpec((1, 1, NCp), lambda b: (b, 0, 0)),
                pl.BlockSpec((1, 1, NCp), lambda b: (b, 0, 0)),
                pl.BlockSpec((1, 1, 1), lambda b: (b, 0, 0)),
            ),
        ),
        compiler_params=pltpu.CompilerParams(
            # batch axis shards across TensorCores on v7x (B is even);
            # near-neutral on single-TC v5e/v6e.
            dimension_semantics=("parallel",),
            # KB-scale tiles: 32 MiB is safe on all of v5e / v6e / v7x.
            vmem_limit_bytes=32 * 1024 * 1024,
        ),
    )(x_pad, w_conv, b_conv, w_head, b_head)
    return logits[:, 0, :], probs[:, 0, :], pred[:, 0, 0]


# --------------------- parameter packing (outside jit) ------------------------

def prepare_params(conv_w, conv_b, fc_w, fc_b):
    """Pre-pack / pre-pad weights once, offline (lane-dense, bf16)."""
    OC, C, KH, KW = conv_w.shape
    NC, OC_in = fc_w.shape
    assert (KH, KW) == (3, 3) and OC_in == OC
    oc_pad = _round_up(OC, LANE)
    nc_pad = _round_up(NC, LANE)

    # [OC, C, 3, 3] -> [3, 3, C, OC] -> [9*C, OC_pad]; row = (3*di+dj)*C + c,
    # matching the in-kernel tap concatenation order.
    w_conv2 = jnp.transpose(conv_w, (2, 3, 1, 0)).reshape(9 * C, OC)
    w_conv2 = jnp.pad(w_conv2, ((0, 0), (0, oc_pad - OC))).astype(jnp.bfloat16)
    b_conv2 = jnp.pad(conv_b.astype(jnp.float32), (0, oc_pad - OC)).reshape(1, oc_pad)

    # Classifier: [NC, OC] -> [OC_pad, NC_pad]; padded classes get a -1e30
    # bias so softmax/argmax never select them.
    w_head = jnp.pad(fc_w, ((0, nc_pad - NC), (0, oc_pad - OC))).T.astype(jnp.bfloat16)
    b_head = jnp.concatenate(
        [fc_b.astype(jnp.float32), jnp.full((nc_pad - NC,), -1e30, jnp.float32)]
    ).reshape(1, nc_pad)

    return dict(w_conv=w_conv2, b_conv=b_conv2, w_head=w_head, b_head=b_head)


# ------------------------------- forward pass ---------------------------------

def forward_and_metrics(x, params, targets, *, num_classes):
    """x: NCHW f32 -> (logits, probs, pred, accuracy), matching the blueprint."""
    B, C, H, W = x.shape
    # NCHW -> NHWC, zero-pad for the 3x3 'same' conv, cast to bf16 once
    # (halves HBM->VMEM DMA bytes for the dominant input).
    xn = jnp.transpose(x, (0, 2, 3, 1))
    xp = jnp.pad(xn, ((0, 0), (1, 1), (1, 1), (0, 0))).astype(jnp.bfloat16)

    # features (stem conv + SiLU) + avgpool + flatten + classifier + softmax +
    # argmax, all fused in a single pallas_call.
    logits_p, probs_p, pred = effnet_forward(
        xp, params["w_conv"], params["b_conv"], params["w_head"],
        params["b_head"], hw_total=H * W)

    logits = logits_p[:, :num_classes]
    probs = probs_p[:, :num_classes]

    # Model_Blueprint.accuracy: mean(argmax(logits, dim=1) == target).
    acc = jnp.mean(jnp.where(pred - targets == 0, 1, 0).astype(jnp.float32))
    return logits, probs, pred, acc


# -------------------------------- reference -----------------------------------

def reference_forward(x, conv_w, conv_b, fc_w, fc_b):
    B, C, H, W = x.shape
    OC = conv_w.shape[0]
    xn = jnp.transpose(x, (0, 2, 3, 1))
    xp = jnp.pad(xn, ((0, 0), (1, 1), (1, 1), (0, 0)))
    acc = jnp.zeros((B, H, W, OC), jnp.float32)
    for di in range(3):
        for dj in range(3):
            acc = acc + jnp.einsum("bhwc,co->bhwo",
                                   xp[:, di:di + H, dj:dj + W, :],
                                   conv_w[:, :, di, dj].T)
    pre = acc + conv_b
    act = pre * (1.0 / (1.0 + jnp.exp(-pre)))
    pooled = act.mean(axis=(1, 2))
    logits = pooled @ fc_w.T + fc_b
    probs = jax.nn.softmax(logits, axis=1)
    pred = jnp.argmax(logits, axis=1)
    return logits, probs, pred


# ----------------------------------- main --------------------------------------

if __name__ == "__main__":
    key = jax.random.PRNGKey(0)
    k1, k2, k3, k4, k5 = jax.random.split(key, 5)

    B, C, H, W = 2, 4, 16, 16
    OC, NUM_CLASSES = 32, 16

    x = jax.random.normal(k1, (B, C, H, W), dtype=jnp.float32)
    conv_w = jax.random.normal(k2, (OC, C, 3, 3), dtype=jnp.float32) * 0.1
    conv_b = jax.random.normal(k3, (OC,), dtype=jnp.float32) * 0.1
    fc_w = jax.random.normal(k4, (NUM_CLASSES, OC), dtype=jnp.float32) * 0.05
    fc_b = jax.random.normal(k5, (NUM_CLASSES,), dtype=jnp.float32) * 0.05
    targets = jnp.array([3, 7], dtype=jnp.int32)

    params = prepare_params(conv_w, conv_b, fc_w, fc_b)
    fwd = jax.jit(functools.partial(forward_and_metrics, num_classes=NUM_CLASSES))

    logits, probs, pred, acc = fwd(x, params, targets)
    jax.block_until_ready((logits, probs, pred, acc))

    ref_logits, ref_probs, _ = reference_forward(x, conv_w, conv_b, fc_w, fc_b)

    assert logits.shape == (B, NUM_CLASSES)
    assert probs.shape == (B, NUM_CLASSES)
    assert pred.shape == (B,)
    assert bool(jnp.all((pred >= 0) & (pred < NUM_CLASSES)))
    assert jnp.allclose(logits, ref_logits, atol=2e-2, rtol=2e-2), "logits mismatch"
    assert jnp.allclose(probs, ref_probs, atol=2e-2, rtol=2e-2), "probs mismatch"
    assert float(jnp.max(jnp.abs(jnp.sum(probs, axis=1) - 1.0))) < 5e-3

    print("KERNEL_OK")
</pallas_src>

<mosaic_0001>
module attributes {stable_mosaic.version = 11 : i64} {
  func.func @_effnet_fused_kernel(%arg0: i32, %arg1: memref<1x18x18x4xbf16, #tpu.memory_space<vmem>>, %arg2: memref<36x128xbf16, #tpu.memory_space<vmem>>, %arg3: memref<1x128xf32, #tpu.memory_space<vmem>>, %arg4: memref<128x128xbf16, #tpu.memory_space<vmem>>, %arg5: memref<1x128xf32, #tpu.memory_space<vmem>>, %arg6: memref<1x1x128xf32, #tpu.memory_space<vmem>>, %arg7: memref<1x1x128xf32, #tpu.memory_space<vmem>>, %arg8: memref<1x1x1xi32, #tpu.memory_space<vmem>>) attributes {dimension_semantics = [#tpu.dimension_semantics<parallel>], iteration_bounds = array<i64: 2>, scalar_prefetch = 0 : i64, scratch_operands = 0 : i64, tpu.core_type = #tpu.core_type<tc>, window_params = [{transform_indices = @transform_0, window_bounds = array<i64: 1, 18, 18, 4>}, {pipeline_mode = #tpu.pipeline_mode<synchronous>, transform_indices = @transform_1, window_bounds = array<i64: 36, 128>}, {pipeline_mode = #tpu.pipeline_mode<synchronous>, transform_indices = @transform_2, window_bounds = array<i64: 1, 128>}, {pipeline_mode = #tpu.pipeline_mode<synchronous>, transform_indices = @transform_3, window_bounds = array<i64: 128, 128>}, {pipeline_mode = #tpu.pipeline_mode<synchronous>, transform_indices = @transform_4, window_bounds = array<i64: 1, 128>}, {transform_indices = @transform_5, window_bounds = array<i64: 1, 1, 128>}, {transform_indices = @transform_6, window_bounds = array<i64: 1, 1, 128>}, {transform_indices = @transform_7, window_bounds = array<i64: 1, 1, 1>}]} {
    %c0 = arith.constant 0 : index
    %c0_0 = arith.constant 0 : index
    %c0_1 = arith.constant 0 : index
    %c0_2 = arith.constant 0 : index
    %0 = vector.load %arg1[%c0, %c0_0, %c0_1, %c0_2] : memref<1x18x18x4xbf16, #tpu.memory_space<vmem>>, vector<1x18x18x4xbf16>
    %1 = vector.shape_cast %0 : vector<1x18x18x4xbf16> to vector<18x18x4xbf16>
    %2 = vector.extract_strided_slice %1 {offsets = [0, 0, 0], sizes = [16, 16, 4], strides = [1, 1, 1]} : vector<18x18x4xbf16> to vector<16x16x4xbf16>
    %3 = vector.extract_strided_slice %1 {offsets = [0, 1, 0], sizes = [16, 16, 4], strides = [1, 1, 1]} : vector<18x18x4xbf16> to vector<16x16x4xbf16>
    %4 = vector.extract_strided_slice %1 {offsets = [0, 2, 0], sizes = [16, 16, 4], strides = [1, 1, 1]} : vector<18x18x4xbf16> to vector<16x16x4xbf16>
    %5 = vector.extract_strided_slice %1 {offsets = [1, 0, 0], sizes = [16, 16, 4], strides = [1, 1, 1]} : vector<18x18x4xbf16> to vector<16x16x4xbf16>
    %6 = vector.extract_strided_slice %1 {offsets = [1, 1, 0], sizes = [16, 16, 4], strides = [1, 1, 1]} : vector<18x18x4xbf16> to vector<16x16x4xbf16>
    %7 = vector.extract_strided_slice %1 {offsets = [1, 2, 0], sizes = [16, 16, 4], strides = [1, 1, 1]} : vector<18x18x4xbf16> to vector<16x16x4xbf16>
    %8 = vector.extract_strided_slice %1 {offsets = [2, 0, 0], sizes = [16, 16, 4], strides = [1, 1, 1]} : vector<18x18x4xbf16> to vector<16x16x4xbf16>
    %9 = vector.extract_strided_slice %1 {offsets = [2, 1, 0], sizes = [16, 16, 4], strides = [1, 1, 1]} : vector<18x18x4xbf16> to vector<16x16x4xbf16>
    %10 = vector.extract_strided_slice %1 {offsets = [2, 2, 0], sizes = [16, 16, 4], strides = [1, 1, 1]} : vector<18x18x4xbf16> to vector<16x16x4xbf16>
    %11 = tpu.concatenate %2, %3, %4, %5, %6, %7, %8, %9, %10 in 2 : vector<16x16x4xbf16>, vector<16x16x4xbf16>, vector<16x16x4xbf16>, vector<16x16x4xbf16>, vector<16x16x4xbf16>, vector<16x16x4xbf16>, vector<16x16x4xbf16>, vector<16x16x4xbf16>, vector<16x16x4xbf16> -> vector<16x16x36xbf16>
    %12 = vector.shape_cast %11 : vector<16x16x36xbf16> to vector<256x36xbf16>
    %c0_3 = arith.constant 0 : index
    %c0_4 = arith.constant 0 : index
    %13 = vector.load %arg2[%c0_3, %c0_4] : memref<36x128xbf16, #tpu.memory_space<vmem>>, vector<36x128xbf16>
    %cst = arith.constant dense<0.000000e+00> : vector<256x128xf32>
    %14 = tpu.matmul %12, %13, %cst {dimension_numbers = #tpu.dot_dimension_numbers<[1], [0], [0], [1], [0, 0, 1, 1], [], []>} : vector<256x36xbf16>, vector<36x128xbf16>, vector<256x128xf32> -> vector<256x128xf32>
    %c0_5 = arith.constant 0 : index
    %c0_6 = arith.constant 0 : index
    %15 = vector.load %arg3[%c0_5, %c0_6] : memref<1x128xf32, #tpu.memory_space<vmem>>, vector<1x128xf32>
    %16 = vector.broadcast %15 : vector<1x128xf32> to vector<256x128xf32>
    %17 = arith.addf %14, %16 : vector<256x128xf32>
    %cst_7 = arith.constant 0.000000e+00 : f32
    %18 = vector.broadcast %cst_7 : f32 to vector<256x128xf32>
    %19 = arith.subf %18, %17 : vector<256x128xf32>
    %20 = math.exp %19 : vector<256x128xf32>
    %cst_8 = arith.constant 1.000000e+00 : f32
    %21 = vector.broadcast %cst_8 : f32 to vector<256x128xf32>
    %22 = arith.addf %21, %20 : vector<256x128xf32>
    %23 = tpu.reciprocal %22 {approx = true} : vector<256x128xf32> -> vector<256x128xf32>
    %24 = arith.mulf %17, %23 : vector<256x128xf32>
    %cst_9 = arith.constant dense<0.000000e+00> : vector<128xf32>
    %25 = vector.multi_reduction <add>, %24, %cst_9 [0] : vector<256x128xf32> to vector<128xf32>
    %cst_10 = arith.constant 3.906250e-03 : f32
    %26 = vector.broadcast %cst_10 : f32 to vector<128xf32>
    %27 = arith.mulf %25, %26 : vector<128xf32>
    %28 = vector.shape_cast %27 : vector<128xf32> to vector<1x128xf32>
    %29 = arith.truncf %28 : vector<1x128xf32> to vector<1x128xbf16>
    %c0_11 = arith.constant 0 : index
    %c0_12 = arith.constant 0 : index
    %30 = vector.load %arg4[%c0_11, %c0_12] : memref<128x128xbf16, #tpu.memory_space<vmem>>, vector<128x128xbf16>
    %cst_13 = arith.constant dense<0.000000e+00> : vector<1x128xf32>
    %31 = tpu.matmul %29, %30, %cst_13 {dimension_numbers = #tpu.dot_dimension_numbers<[1], [0], [0], [1], [0, 0, 1, 1], [], []>} : vector<1x128xbf16>, vector<128x128xbf16>, vector<1x128xf32> -> vector<1x128xf32>
    %c0_14 = arith.constant 0 : index
    %c0_15 = arith.constant 0 : index
    %32 = vector.load %arg5[%c0_14, %c0_15] : memref<1x128xf32, #tpu.memory_space<vmem>>, vector<1x128xf32>
    %33 = arith.addf %31, %32 : vector<1x128xf32>
    %c0_16 = arith.constant 0 : index
    %c0_17 = arith.constant 0 : index
    %c0_18 = arith.constant 0 : index
    %34 = vector.load %arg6[%c0_16, %c0_17, %c0_18] : memref<1x1x128xf32, #tpu.memory_space<vmem>>, vector<1x1x128xf32>
    %35 = vector.shape_cast %34 : vector<1x1x128xf32> to vector<1x128xf32>
    %36 = vector.shape_cast %33 : vector<1x128xf32> to vector<1x1x128xf32>
    tpu.vector_store %arg6[%c0_16, %c0_17, %c0_18], %36 {strides = array<i32>} : memref<1x1x128xf32, #tpu.memory_space<vmem>>, vector<1x1x128xf32>,
    %cst_19 = arith.constant dense<0xFF800000> : vector<1xf32>
    %37 = vector.multi_reduction <maximumf>, %33, %cst_19 [1] : vector<1x128xf32> to vector<1xf32>
    %38 = vector.shape_cast %37 : vector<1xf32> to vector<1x1xf32>
    %39 = vector.broadcast %38 : vector<1x1xf32> to vector<1x128xf32>
    %40 = arith.subf %33, %39 : vector<1x128xf32>
    %41 = math.exp %40 : vector<1x128xf32>
    %cst_20 = arith.constant dense<0.000000e+00> : vector<1xf32>
    %42 = vector.multi_reduction <add>, %41, %cst_20 [1] : vector<1x128xf32> to vector<1xf32>
    %43 = vector.shape_cast %42 : vector<1xf32> to vector<1x1xf32>
    %44 = tpu.reciprocal %43 {approx = true} : vector<1x1xf32> -> vector<1x1xf32>
    %45 = vector.broadcast %44 : vector<1x1xf32> to vector<1x128xf32>
    %46 = arith.mulf %41, %45 : vector<1x128xf32>
    %c0_21 = arith.constant 0 : index
    %c0_22 = arith.constant 0 : index
    %c0_23 = arith.constant 0 : index
    %47 = vector.load %arg7[%c0_21, %c0_22, %c0_23] : memref<1x1x128xf32, #tpu.memory_space<vmem>>, vector<1x1x128xf32>
    %48 = vector.shape_cast %47 : vector<1x1x128xf32> to vector<1x128xf32>
    %49 = vector.shape_cast %46 : vector<1x128xf32> to vector<1x1x128xf32>
    tpu.vector_store %arg7[%c0_21, %c0_22, %c0_23], %49 {strides = array<i32>} : memref<1x1x128xf32, #tpu.memory_space<vmem>>, vector<1x1x128xf32>,
    %50 = tpu.iota {dimensions = array<i32: 1>} : vector<1x128xi32>
    %51 = vector.broadcast %38 : vector<1x1xf32> to vector<1x128xf32>
    %52 = arith.cmpf oeq, %33, %51 : vector<1x128xf32>
    %c128_i32 = arith.constant 128 : i32
    %53 = vector.broadcast %c128_i32 : i32 to vector<1x128xi32>
    %54 = arith.select %52, %50, %53 : vector<1x128xi1>, vector<1x128xi32>
    %cst_24 = arith.constant dense<2147483647> : vector<1xi32>
    %55 = vector.multi_reduction <minsi>, %54, %cst_24 [1] : vector<1x128xi32> to vector<1xi32>
    %56 = vector.shape_cast %55 : vector<1xi32> to vector<1x1xi32>
    %c0_25 = arith.constant 0 : index
    %c0_26 = arith.constant 0 : index
    %c0_27 = arith.constant 0 : index
    %57 = vector.load %arg8[%c0_25, %c0_26, %c0_27] : memref<1x1x1xi32, #tpu.memory_space<vmem>>, vector<1x1x1xi32>
    %58 = vector.shape_cast %57 : vector<1x1x1xi32> to vector<1x1xi32>
    %59 = vector.shape_cast %56 : vector<1x1xi32> to vector<1x1x1xi32>
    tpu.vector_store %arg8[%c0_25, %c0_26, %c0_27], %59 {strides = array<i32>} : memref<1x1x1xi32, #tpu.memory_space<vmem>>, vector<1x1x1xi32>,
    return
  }
  func.func @transform_0(%arg0: i32) -> (i32, i32, i32, i32) {
    %c0_i32 = arith.constant 0 : i32
    %c0_i32_0 = arith.constant 0 : i32
    %c0_i32_1 = arith.constant 0 : i32
    %c0_i32_2 = arith.constant 0 : i32
    return %arg0, %c0_i32, %c0_i32_0, %c0_i32_1 : i32, i32, i32, i32
  }
  func.func @transform_1(%arg0: i32) -> (i32, i32) {
    %c0_i32 = arith.constant 0 : i32
    %c0_i32_0 = arith.constant 0 : i32
    %c0_i32_1 = arith.constant 0 : i32
    return %c0_i32, %c0_i32_0 : i32, i32
  }
  func.func @transform_2(%arg0: i32) -> (i32, i32) {
    %c0_i32 = arith.constant 0 : i32
    %c0_i32_0 = arith.constant 0 : i32
    %c0_i32_1 = arith.constant 0 : i32
    return %c0_i32, %c0_i32_0 : i32, i32
  }
  func.func @transform_3(%arg0: i32) -> (i32, i32) {
    %c0_i32 = arith.constant 0 : i32
    %c0_i32_0 = arith.constant 0 : i32
    %c0_i32_1 = arith.constant 0 : i32
    return %c0_i32, %c0_i32_0 : i32, i32
  }
  func.func @transform_4(%arg0: i32) -> (i32, i32) {
    %c0_i32 = arith.constant 0 : i32
    %c0_i32_0 = arith.constant 0 : i32
    %c0_i32_1 = arith.constant 0 : i32
    return %c0_i32, %c0_i32_0 : i32, i32
  }
  func.func @transform_5(%arg0: i32) -> (i32, i32, i32) {
    %c0_i32 = arith.constant 0 : i32
    %c0_i32_0 = arith.constant 0 : i32
    %c0_i32_1 = arith.constant 0 : i32
    return %arg0, %c0_i32, %c0_i32_0 : i32, i32, i32
  }
  func.func @transform_6(%arg0: i32) -> (i32, i32, i32) {
    %c0_i32 = arith.constant 0 : i32
    %c0_i32_0 = arith.constant 0 : i32
    %c0_i32_1 = arith.constant 0 : i32
    return %arg0, %c0_i32, %c0_i32_0 : i32, i32, i32
  }
  func.func @transform_7(%arg0: i32) -> (i32, i32, i32) {
    %c0_i32 = arith.constant 0 : i32
    %c0_i32_0 = arith.constant 0 : i32
    %c0_i32_1 = arith.constant 0 : i32
    return %arg0, %c0_i32, %c0_i32_0 : i32, i32, i32
  }
}

</mosaic_0001>

<bundles_post_ra>
// kernel: forward_and_metrics.1
= control target key start
LH: loop header
LB: loop body
LE: loop exit
PB: predicated region body
PF: predicated region fallthrough
CT: control target
= control target key end

     0   :  { %s3276_s0 = inlined_call_operand.vmem [shape: bf16[2,18,18,4], index: 0, kind: input, shape index: {}]   ;;  %s3277_s1 = inlined_call_operand.vmem [shape: bf16[36,128], index: 1, kind: input, shape index: {}]   ;;  %s3278_s2 = inlined_call_operand.vmem [shape: f32[1,128], index: 2, kind: input, shape index: {}]   ;;  %s3279_s3 = inlined_call_operand.vmem [shape: bf16[128,128], index: 3, kind: input, shape index: {}]   ;;  %s3280_s4 = inlined_call_operand.vmem [shape: f32[1,128], index: 4, kind: input, shape index: {}]   ;;  %s3281_s5 = inlined_call_operand.hbm [shape: f32[2,1,128], index: 5, kind: output, shape index: {0}]   ;;  %s3282_s6 = inlined_call_operand.hbm [shape: f32[2,1,128], index: 6, kind: output, shape index: {1}]   ;;  %s3283_s7 = inlined_call_operand.vmem [shape: s32[2,1,1], index: 7, kind: output, shape index: {2}]  }
   0x1   :  { %3284 = sst [smem:[#allocation8_spill]] %s3276_s0 }
   0x2   :  { %13 = vsyncpa [#allocation3], 0 }
   0x3   :  { %15 = vsyncpa [#allocation3 + $0x1], 0 }
   0x4   :  { %16 = vsyncpa [#allocation5], 0 }
   0x5   :  { %18 = vsyncpa [#allocation5 + $0x1], 0  ;;  %s2561_s24 = smov 0   ;;  %s2563_s25 = smov 0  }
   0x6   :  { %s2565_s26 = smov 0   ;;  %s2567_s27 = smov 0  }
   0x7 LB: > { %s2582_s28 = sadd.s32 4294967295, %s2507_s27   ;;  %s2019_s29 = sadd.s32 4294967294, %s2507_s27   ;;  %s2507_s27 = sphi %s2567_s27, %s3291_s27   ;;  %s2503_s26 = sphi %s2565_s26, %s3290_s26   ;;  %s2499_s25 = sphi %s2563_s25, %s3289_s25   ;;  %s2495_s24 = sphi %s2561_s24, %s3288_s24  }
   0x8   : > { %s2586_s30 = sadd.s32 1, %s2507_s27   ;;  %s141_s8 = sadd.s32 1, %s2503_s26 }
   0x9   : > { %s138_s9 = ssub.s32 %s2507_s27, %s2586_s30  ;;  %p151_p0 = scmp.ne.s32.totalorder %s2503_s26, %s2499_s25 }
   0xa   : > { %p139_p1 = scmp.eq.s32.totalorder %s138_s9, 0  ;;  %p152_p2 = scmp.eq.s32.totalorder %s2582_s28, 1 }
   0xb   : > { %p157_p3 = scmp.ne.s32.totalorder %s2499_s25, %s2495_s24  ;;  %p158_p4 = scmp.eq.s32.totalorder %s2019_s29, 1 }
   0xc   : > { %s2597_s10 = scalar_select %p139_p1, %s2503_s26, %s141_s8  }
   0xd   : > { %p2599_p5 = por %p152_p2, %p151_p0  ;;  %p2603_p6 = por %p158_p4, %p157_p3 }
   0xe   : > { %p2022_p7 = scmp.ge.s32.totalorder %s2507_s27, 1  ;;  %p248_p8 = scmp.lt.s32.totalorder %s2507_s27, 3 }
  0x10   : > { %p249_p9 = pnand %p2022_p7, %p248_p8 }
  0x11   : > { %p286_p10 = scmp.lt.s32.totalorder (!%p249_p9), %s2582_s28, 1  ;;  %s3287_s0 = sld [smem:[#allocation8_spill]] (!%p249_p9)  ;;  %vm702_vm0 = vcmask (!%p249_p9), 1046528   ;;  %vm477_vm1 = vsmask.f32 (!%p249_p9), 7424  ;;  %v2254_v44 = vld [vmem:[%s3277_s1] sm:$0xff] (!%p249_p9)  }
  0x12   : > { %252 = sbr.rel (%p249_p9) target bundleno = 1324 (0x52c), region = 40  ;;  %s2509_s18 = smov (!%p249_p9), 12   ;;  %2120 = vmatprep.subr.bf16.mxu0 (!%p249_p9), %v2254_v44  ;;  %v2256_v46 = vld [vmem:[%s3277_s1 + $0x8] sm:$0xff] (!%p249_p9)   ;;  %v2258_v50 = vld [vmem:[%s3277_s1 + $0x10] ss:$0 sps:$4 sm:$0x33] (!%p249_p9)  }
  0x13   : > { %s2510_s19 = smov (!%p249_p9), 20   ;;  %s2511_s20 = smov (!%p249_p9), 8   ;;  %2121 = vmatpush3.bf16.msra.mxu0 (!%p249_p9), %v2254_v44  ;;  %vm1345_vm2 = vcmask (!%p249_p9), 1041408   ;;  %vm1021_vm3 = vcmask (!%p249_p9), 31744   ;;  %vm1054_vm4 = vcmask (!%p249_p9), 64512   ;;  %vm1087_vm5 = vcmask (!%p249_p9), 97280  }
  0x14   : > { %s2512_s21 = smov (!%p249_p9), 4   ;;  %s2513_s22 = smov (!%p249_p9), 16   ;;  %2122 = vmatprep.subr.bf16.mxu0 (!%p249_p9), %v2256_v46  ;;  %v1347_v54 = vsel (!%p249_p9), %vm1345_vm2, %v2258_v50, 0  ;;  %vm1120_vm6 = vcmask (!%p249_p9), 130048   ;;  %vm1153_vm7 = vcmask (!%p249_p9), 162816   ;;  %vm1186_vm8 = vcmask (!%p249_p9), 195584  }
  0x15   : > { %s2514_s8 = smov (!%p249_p9), 24   ;;  %s2515_s15 = smov (!%p249_p9), 28   ;;  %vm1219_vm9 = vcmask (!%p249_p9), 228352   ;;  %vm1252_vm10 = vcmask (!%p249_p9), 261120   ;;  %vm1312_vm11 = vcmask (!%p249_p9), 293888   ;;  %vm2518_vm12 = vmmov (!%p249_p9), 0  }
  0x16   : > { %s2516_s29 = smov (!%p249_p9), 32   ;;  %vm1847_vm13 = vcmask (!%p249_p9), 1040384  }
  0x17   : > { %2123 = vmatpush3.bf16.msra.mxu0 (!%p249_p9), %v2256_v46 }
  0x18   : > { %2178 = vmatprep.subr.msk.bf16.mxu0 (!%p249_p9), %vm1345_vm2, %v2258_v50 }
  0x19   : > { %s2611_s13 = scalar_select %p286_p10, %s2582_s28, 1 }
  0x1b   : > { %s2179_s14 = smul.u32 216, %s2611_s13  ;;  %2125 = vmatpush3.bf16.msra.mxu0 %v1347_v54 }
  0x1d   : > { %s2617_s17 = scalar_lea.vmem %s3287_s0, %s2179_s14 }
  0x1e   : > { %v2620_v0 = vld [vmem:[%s2617_s17 + $0x18] sm:$0xff]   ;;  %v2623_v1 = vld [vmem:[%s2617_s17 + $0xc] sm:$0xff]   ;;  %v2236_v2 = vld [vmem:[%s2617_s17 + $0x14] ss:$0 sps:$4 sm:$0x11]  }
  0x1f   : > { %790 = vrot.lane.b32.xlu1 %v2620_v0, %s2509_s18  ;;  %v2629_v3 = vld [vmem:[%s2617_s17] sm:$0xff]   ;;  %788 = vrot.lane.b32.xlu0 %v2623_v1, %s2509_s18  ;;  %v706_v4 = vrot.slane %v2623_v1, 1  ;;  %v707_v5 = vrot.slane %v2236_v2, 1  ;;  %v2238_v6 = vld [vmem:[%s2617_s17 + $0x8] ss:$0 sps:$4 sm:$0x11]  }
  0x20   : > { %v703_v7 = vrot.slane %v2629_v3, 1  ;;  %v479_v8 = vshrl.u32 %v2629_v3, 16  ;;  %v481_v9 = vshll.u32 %v2629_v3, 16  ;;  %v491_v10 = vshrl.u32 %v2623_v1, 16  ;;  %v2649_v30 = vld [vmem:[%s2617_s17 + $0x24] sm:$0xff]   ;;  %v2679_v49 = vld [vmem:[%s2617_s17 + $0x30] sm:$0xff]  }
  0x21   : > { %v708_v11 = vsel %vm702_vm0, %v706_v4, %v707_v5  ;;  %v704_v12 = vrot.slane %v2238_v6, 1  ;;  %v486_v13 = vshll.u32 %v2238_v6, 16  ;;  %v2239_v14 = vld [vmem:[%s2617_s17 + $0x20] ss:$0 sps:$4 sm:$0x11]   ;;  %v493_v15 = vshll.u32 %v2623_v1, 16 }
  0x22   : > { %v483_v16 = vrot.slane %v481_v9, 1  ;;  %v498_v17 = vshll.u32 %v2236_v2, 16  ;;  %v505_v18 = vshll.u32 %v2620_v0, 16  ;;  %v709_v23 = vrot.slane %v2620_v0, 1  ;;  %v2695_v60 = vld [vmem:[%s2617_s17 + $0x3c] sm:$0xff]  }
  0x23   : > { %870 = vrot.lane.b32.xlu0 %v708_v11, %s2510_s19  ;;  %v705_v19 = vsel %vm702_vm0, %v703_v7, %v704_v12  ;;  %v488_v20 = vrot.slane %v486_v13, 1  ;;  %v495_v21 = vrot.slane %v493_v15, 1  ;;  %v503_v25 = vshrl.u32 %v2620_v0, 16  ;;  %v2241_v33 = vld [vmem:[%s2617_s17 + $0x2c] ss:$0 sps:$4 sm:$0x11]  }
  0x24   : > { %751 = vrot.lane.b32.xlu1 %v705_v19, %s2511_s20  ;;  %v484_v22 = vor.u32 %v483_v16, %v479_v8  ;;  %v500_v24 = vrot.slane %v498_v17, 1  ;;  %v710_v26 = vrot.slane %v2239_v14, 1  ;;  %v507_v28 = vrot.slane %v505_v18, 1  ;;  %v2243_v51 = vld [vmem:[%s2617_s17 + $0x38] ss:$0 sps:$4 sm:$0x11]  }
  0x25   : > { %v496_v27 = vor.u32 %v495_v21, %v491_v10  ;;  %v510_v29 = vshll.u32 %v2239_v14, 16  ;;  %v517_v37 = vshll.u32 %v2649_v30, 16  ;;  %v515_v39 = vshrl.u32 %v2649_v30, 16  ;;  %v2245_v62 = vld [vmem:[%s2617_s17 + $0x44] ss:$0 sps:$4 sm:$0x11]  }
  0x26   : > { %v489_v31 = vsel %vm477_vm1, %v484_v22, %v488_v20  ;;  %v711_v34 = vsel %vm702_vm0, %v709_v23, %v710_v26  ;;  %v508_v35 = vor.u32 %v507_v28, %v503_v25  ;;  %v522_v41 = vshll.u32 %v2241_v33, 16  ;;  %v2720_v14 = vld [vmem:[%s2617_s17 + $0x48] sm:$0xff]   ;;  %v2247_v16 = vld [vmem:[%s2617_s17 + $0x50] ss:$0 sps:$4 sm:$0x11]   ;;  %v2733_v23 = vld [vmem:[%s2617_s17 + $0x54] sm:$0xff]  }
  0x27   : > { %670 = vrot.lane.b32.xlu0 %v489_v31, %s2512_s21  ;;  %v501_v32 = vsel %vm477_vm1, %v496_v27, %v500_v24  ;;  %v512_v36 = vrot.slane %v510_v29, 1  ;;  %v519_v40 = vrot.slane %v517_v37, 1  ;;  %v712_v47 = vrot.slane %v2649_v30, 1  ;;  %v2249_v27 = vld [vmem:[%s2617_s17 + $0x5c] ss:$0 sps:$4 sm:$0x11]  }
  0x28   : > { %753 = vrot.lane.b32.xlu1 %v708_v11, %s2511_s20  ;;  %v524_v43 = vrot.slane %v522_v41, 1  ;;  %v713_v48 = vrot.slane %v2241_v33, 1  ;;  %v529_v53 = vshll.u32 %v2679_v49, 16  ;;  %v527_v55 = vshrl.u32 %v2679_v49, 16 }
  0x29   : > { %v513_v38 = vsel %vm477_vm1, %v508_v35, %v512_v36  ;;  %v520_v42 = vor.u32 %v519_v40, %v515_v39  ;;  %v534_v57 = vshll.u32 %v2243_v51, 16  ;;  %v715_v61 = vrot.slane %v2679_v49, 1  ;;  %v2758_v39 = vld [vmem:[%s2617_s17 + $0x60] sm:$0xff]   ;;  %v2251_v41 = vld [vmem:[%s2617_s17 + $0x68] ss:$0 sps:$4 sm:$0x11]  }
  0x2a   : > { %v714_v52 = vsel %vm702_vm0, %v712_v47, %v713_v48  ;;  %v531_v56 = vrot.slane %v529_v53, 1  ;;  %v716_v2 = vrot.slane %v2243_v51, 1  ;;  %v541_v4 = vshll.u32 %v2695_v60, 16  ;;  %v2771_v48 = vld [vmem:[%s2617_s17 + $0x6c] sm:$0xff]  }
  0x2b   : > { %672 = vrot.lane.b32.xlu0 %v501_v32, %s2512_s21  ;;  %v525_v45 = vsel %vm477_vm1, %v520_v42, %v524_v43  ;;  %v536_v59 = vrot.slane %v534_v57, 1  ;;  %v539_v6 = vshrl.u32 %v2695_v60, 16  ;;  %v546_v8 = vshll.u32 %v2245_v62, 16  ;;  %v2253_v53 = vld [vmem:[%s2617_s17 + $0x74] ss:$0 sps:$4 sm:$0x11]  }
  0x2c   : > { %872 = vrot.lane.b32.xlu1 %v711_v34, %s2510_s19  ;;  %v532_v58 = vor.u32 %v531_v56, %v527_v55  ;;  %v717_v5 = vsel %vm702_vm0, %v715_v61, %v716_v2  ;;  %v543_v7 = vrot.slane %v541_v4, 1  ;;  %v718_v12 = vrot.slane %v2695_v60, 1 }
  0x2d   : > { %v548_v10 = vrot.slane %v546_v8, 1  ;;  %v719_v13 = vrot.slane %v2245_v62, 1  ;;  %v553_v17 = vshll.u32 %v2720_v14, 16  ;;  %v551_v18 = vshrl.u32 %v2720_v14, 16 }
  0x2e   : > { %v537_v63 = vsel %vm477_vm1, %v532_v58, %v536_v59  ;;  %v544_v9 = vor.u32 %v543_v7, %v539_v6  ;;  %v558_v20 = vshll.u32 %v2247_v16, 16  ;;  %v721_v25 = vrot.slane %v2720_v14, 1 }
  0x2f   : > { %835 = vrot.lane.b32.xlu0 %v501_v32, %s2513_s22  ;;  %v720_v15 = vsel %vm702_vm0, %v718_v12, %v719_v13  ;;  %v555_v19 = vrot.slane %v553_v17, 1  ;;  %v722_v26 = vrot.slane %v2247_v16, 1  ;;  %v565_v28 = vshll.u32 %v2733_v23, 16  ;;  %v2257_v13 = vld [vmem:[%s2617_s17 + $0x80] ss:$0 sps:$4 sm:$0x11]  }
  0x30   : > { %837 = vrot.lane.b32.xlu1 %v513_v38, %s2513_s22  ;;  %v549_v11 = vsel %vm477_vm1, %v544_v9, %v548_v10  ;;  %v560_v22 = vrot.slane %v558_v20, 1  ;;  %v563_v31 = vshrl.u32 %v2733_v23, 16  ;;  %v570_v33 = vshll.u32 %v2249_v27, 16  ;;  %v2796_v9 = vld [vmem:[%s2617_s17 + $0x78] sm:$0xff]  }
  0x31   : > { %v556_v21 = vor.u32 %v555_v19, %v551_v18  ;;  %v723_v29 = vsel %vm702_vm0, %v721_v25, %v722_v26  ;;  %v567_v32 = vrot.slane %v565_v28, 1  ;;  %v724_v37 = vrot.slane %v2733_v23, 1  ;;  %v2814_v28 = vld [vmem:[%s2617_s17 + $0x84] sm:$0xff]  }
  0x32   : > { %v572_v35 = vrot.slane %v570_v33, 1  ;;  %v577_v42 = vshll.u32 %v2758_v39, 16  ;;  %v575_v43 = vshrl.u32 %v2758_v39, 16  ;;  %v727_v51 = vrot.slane %v2758_v39, 1 }
  0x33   : > { %907 = vrot.lane.b32.xlu0 %v2620_v0, %s2514_s8  ;;  %v561_v24 = vsel %vm477_vm1, %v556_v21, %v560_v22  ;;  %v589_v54 = vshll.u32 %v2771_v48, 16  ;;  %v587_v56 = vshrl.u32 %v2771_v48, 16  ;;  %v594_v58 = vshll.u32 %v2253_v53, 16 }
  0x34   : > { %909 = vrot.lane.b32.xlu1 %v2649_v30, %s2514_s8  ;;  %v579_v44 = vrot.slane %v577_v42, 1  ;;  %v730_v6 = vrot.slane %v2771_v48, 1  ;;  %v731_v7 = vrot.slane %v2253_v53, 1  ;;  %v599_v19 = vshrl.u32 %v2796_v9, 16 }
  0x35   : > { %v591_v57 = vrot.slane %v589_v54, 1  ;;  %v606_v21 = vshll.u32 %v2257_v13, 16  ;;  %v733_v33 = vrot.slane %v2796_v9, 1 }
  0x36   : > { %v580_v46 = vor.u32 %v579_v44, %v575_v43 }
  0x37   : > { %954 = vrot.lane.b32.xlu0 %v513_v38, %s2515_s15  ;;  %v592_v62 = vor.u32 %v591_v57, %v587_v56 }
  0x38   : > { %956 = vrot.lane.b32.xlu1 %v525_v45, %s2515_s15 }
  0x3b   : > { %989 = vrot.lane.b32.xlu0 %v711_v34, %s2516_s29 }
  0x3c   : > { %674 = vrot.lane.b32.xlu1 %v513_v38, %s2512_s21  ;;  %v725_v38 = vrot.slane %v2249_v27, 1 }
  0x3e   : > { %v726_v40 = vsel %vm702_vm0, %v724_v37, %v725_v38  ;;  %v2260_v38 = vld [vmem:[%s2617_s17 + $0x8c] ss:$0 sps:$4 sm:$0x11]  }
  0x3f   : > { %991 = vrot.lane.b32.xlu0 %v714_v52, %s2516_s29 }
  0x40   : > { %676 = vrot.lane.b32.xlu1 %v525_v45, %s2512_s21 }
  0x43   : > { %755 = vrot.lane.b32.xlu0 %v711_v34, %s2511_s20  ;;  %v568_v34 = vor.u32 %v567_v32, %v563_v31 }
  0x44   : > { %757 = vrot.lane.b32.xlu1 %v714_v52, %s2511_s20 }
  0x45   : > { %v573_v36 = vsel %vm477_vm1, %v568_v34, %v572_v35  ;;  %v734_v34 = vrot.slane %v2257_v13, 1 }
  0x47   : > { %792 = vrot.lane.b32.xlu0 %v2649_v30, %s2509_s18 }
  0x48   : > { %794 = vrot.lane.b32.xlu1 %v2679_v49, %s2509_s18 }
  0x4b   : > { %839 = vrot.lane.b32.xlu0 %v525_v45, %s2513_s22  ;;  %v582_v45 = vshll.u32 %v2251_v41, 16 }
  0x4c   : > { %841 = vrot.lane.b32.xlu1 %v537_v63, %s2513_s22 }
  0x4d   : > { %v584_v47 = vrot.slane %v582_v45, 1  ;;  %v735_v45 = vsel %vm702_vm0, %v733_v33, %v734_v34 }
  0x4f   : > { %874 = vrot.lane.b32.xlu0 %v714_v52, %s2510_s19  ;;  %v585_v50 = vsel %vm477_vm1, %v580_v46, %v584_v47  ;;  %v728_v52 = vrot.slane %v2251_v41, 1 }
  0x50   : > { %876 = vrot.lane.b32.xlu1 %v717_v5, %s2510_s19 }
  0x51   : > { %v729_v55 = vsel %vm702_vm0, %v727_v51, %v728_v52  ;;  %v618_v52 = vshll.u32 %v2260_v38, 16 }
  0x53   : > { %911 = vrot.lane.b32.xlu0 %v2679_v49, %s2514_s8 }
  0x54   : > { %913 = vrot.lane.b32.xlu1 %v2695_v60, %s2514_s8 }
  0x57   : > { %958 = vrot.lane.b32.xlu0 %v537_v63, %s2515_s15 }
  0x58   : > { %960 = vrot.lane.b32.xlu1 %v549_v11, %s2515_s15 }
  0x5b   : > { %993 = vrot.lane.b32.xlu0 %v717_v5, %s2516_s29 }
  0x5c   : > { %678 = vrot.lane.b32.xlu1 %v537_v63, %s2512_s21  ;;  %v596_v63 = vrot.slane %v594_v58, 1 }
  0x5e   : > { %v597_v4 = vsel %vm477_vm1, %v592_v62, %v596_v63 }
  0x5f   : > { %995 = vrot.lane.b32.xlu0 %v720_v15, %s2516_s29 }
  0x60   : > { %680 = vrot.lane.b32.xlu1 %v549_v11, %s2512_s21 }
  0x63   : > { %759 = vrot.lane.b32.xlu0 %v717_v5, %s2511_s20 }
  0x64   : > { %761 = vrot.lane.b32.xlu1 %v720_v15, %s2511_s20 }
  0x67   : > { %796 = vrot.lane.b32.xlu0 %v2695_v60, %s2509_s18 }
  0x68   : > { %798 = vrot.lane.b32.xlu1 %v2720_v14, %s2509_s18 }
  0x6b   : > { %843 = vrot.lane.b32.xlu0 %v549_v11, %s2513_s22  ;;  %v732_v11 = vsel %vm702_vm0, %v730_v6, %v731_v7  ;;  %v736_v6 = vrot.slane %v2814_v28, 1  ;;  %v737_v7 = vrot.slane %v2260_v38, 1 }
  0x6c   : > { %845 = vrot.lane.b32.xlu1 %v561_v24, %s2513_s22 }
  0x6f   : > { %878 = vrot.lane.b32.xlu0 %v720_v15, %s2510_s19  ;;  %v601_v15 = vshll.u32 %v2796_v9, 16 }
  0x70   : > { %880 = vrot.lane.b32.xlu1 %v723_v29, %s2510_s19 }
  0x71   : > { %v603_v20 = vrot.slane %v601_v15, 1  ;;  %v2262_v15 = vld [vmem:[%s2617_s17 + $0x98] ss:$0 sps:$4 sm:$0x11]  }
  0x73   : > { %915 = vrot.lane.b32.xlu0 %v2720_v14, %s2514_s8  ;;  %v604_v27 = vor.u32 %v603_v20, %v599_v19 }
  0x74   : > { %917 = vrot.lane.b32.xlu1 %v2733_v23, %s2514_s8 }
  0x77   : > { %962 = vrot.lane.b32.xlu0 %v561_v24, %s2515_s15 }
  0x78   : > { %964 = vrot.lane.b32.xlu1 %v573_v36, %s2515_s15 }
  0x7b   : > { %997 = vrot.lane.b32.xlu0 %v723_v29, %s2516_s29 }
  0x7c   : > { %682 = vrot.lane.b32.xlu1 %v561_v24, %s2512_s21 }
  0x7f   : > { %999 = vrot.lane.b32.xlu0 %v726_v40, %s2516_s29 }
  0x80   : > { %684 = vrot.lane.b32.xlu1 %v573_v36, %s2512_s21 }
  0x83   : > { %763 = vrot.lane.b32.xlu0 %v723_v29, %s2511_s20 }
  0x84   : > { %765 = vrot.lane.b32.xlu1 %v726_v40, %s2511_s20 }
  0x87   : > { %800 = vrot.lane.b32.xlu0 %v2733_v23, %s2509_s18 }
  0x88   : > { %802 = vrot.lane.b32.xlu1 %v2758_v39, %s2509_s18 }
  0x8b   : > { %847 = vrot.lane.b32.xlu0 %v573_v36, %s2513_s22 }
  0x8c   : > { %849 = vrot.lane.b32.xlu1 %v585_v50, %s2513_s22 }
  0x8f   : > { %882 = vrot.lane.b32.xlu0 %v726_v40, %s2510_s19  ;;  %v613_v40 = vshll.u32 %v2814_v28, 16 }
  0x90   : > { %884 = vrot.lane.b32.xlu1 %v729_v55, %s2510_s19 }
  0x91   : > { %v791_v59 = vpop.permute.xlu1 %790  ;;  %v789_v61 = vpop.permute.xlu0 %788  ;;  %v615_v51 = vrot.slane %v613_v40, 1 }
  0x93   : > { %919 = vrot.lane.b32.xlu0 %v2758_v39, %s2514_s8 }
  0x94   : > { %921 = vrot.lane.b32.xlu1 %v2771_v48, %s2514_s8 }
  0x95   : > { %v871_v2 = vpop.permute.xlu0 %870 }
  0x96   : > { %v752_v5 = vpop.permute.xlu1 %751 }
  0x97   : > { %966 = vrot.lane.b32.xlu0 %v585_v50, %s2515_s15 }
  0x98   : > { %968 = vrot.lane.b32.xlu1 %v597_v4, %s2515_s15 }
  0x99   : > { %v671_v8 = vpop.permute.xlu0 %670 }
  0x9a   : > { %v754_v10 = vpop.permute.xlu1 %753  ;;  %v1023_v17 = vsel %vm1021_vm3, %v2629_v3, %v671_v8  ;;  %v608_v3 = vrot.slane %v606_v21, 1  ;;  %v630_v21 = vshll.u32 %v2262_v15, 16 }
  0x9b   : > { %1001 = vrot.lane.b32.xlu0 %v729_v55, %s2516_s29  ;;  %v1056_v25 = vsel %vm1054_vm4, %v1023_v17, %v752_v5 }
  0x9c   : > { %686 = vrot.lane.b32.xlu1 %v585_v50, %s2512_s21  ;;  %v1089_v32 = vsel %vm1087_vm5, %v1056_v25, %v789_v61  ;;  %v609_v37 = vsel %vm477_vm1, %v604_v27, %v608_v3  ;;  %v611_v50 = vshrl.u32 %v2814_v28, 16  ;;  %v620_v61 = vrot.slane %v618_v52, 1  ;;  %v2867_v27 = vld [vmem:[%s2617_s17 + $0x9c] sm:$0xff]  }
  0x9d   : > { %v673_v12 = vpop.permute.xlu0 %672 }
  0x9e   : > { %v873_v16 = vpop.permute.xlu1 %872  ;;  %v1025_v24 = vsel %vm1021_vm3, %v2623_v1, %v673_v12  ;;  %v738_v12 = vsel %vm702_vm0, %v736_v6, %v737_v7  ;;  %v742_v6 = vrot.slane %v2867_v27, 1 }
  0x9f   : > { %1003 = vrot.lane.b32.xlu0 %v732_v11, %s2516_s29  ;;  %v1058_v29 = vsel %vm1054_vm4, %v1025_v24, %v754_v10  ;;  %v2854_v10 = vld [vmem:[%s2617_s17 + $0x90] sm:$0xff]  }
  0xa0   : > { %688 = vrot.lane.b32.xlu1 %v597_v4, %s2512_s21  ;;  %v1091_v35 = vsel %vm1087_vm5, %v1058_v29, %v791_v59  ;;  %v616_v59 = vor.u32 %v615_v51, %v611_v50  ;;  %v623_v19 = vshrl.u32 %v2854_v10, 16 }
  0xa1   : > { %v836_v18 = vpop.permute.xlu0 %835 }
  0xa2   : > { %v838_v22 = vpop.permute.xlu1 %837  ;;  %v1122_v1 = vsel %vm1120_vm6, %v1089_v32, %v836_v18  ;;  %v739_v32 = vrot.slane %v2854_v10, 1 }
  0xa3   : > { %767 = vrot.lane.b32.xlu0 %v729_v55, %s2511_s20  ;;  %v1155_v42 = vsel %vm1153_vm7, %v1122_v1, %v871_v2  ;;  %v1124_v43 = vsel %vm1120_vm6, %v1091_v35, %v838_v22  ;;  %v740_v1 = vrot.slane %v2262_v15, 1 }
  0xa4   : > { %769 = vrot.lane.b32.xlu1 %v732_v11, %s2511_s20  ;;  %v1157_v55 = vsel %vm1153_vm7, %v1124_v43, %v873_v16  ;;  %v625_v16 = vshll.u32 %v2854_v10, 16 }
  0xa5   : > { %v908_v26 = vpop.permute.xlu0 %907 }
  0xa6   : > { %v910_v31 = vpop.permute.xlu1 %909  ;;  %v1188_v44 = vsel %vm1186_vm8, %v1155_v42, %v908_v26  ;;  %v627_v20 = vrot.slane %v625_v16, 1  ;;  %v632_v26 = vrot.slane %v630_v21, 1  ;;  %v2266_v16 = vld [vmem:[%s2617_s17 + $0xb0] ss:$0 sps:$4 sm:$0x11]  }
  0xa7   : > { %804 = vrot.lane.b32.xlu0 %v2771_v48, %s2509_s18  ;;  %v1190_v56 = vsel %vm1186_vm8, %v1157_v55, %v910_v31 }
  0xa8   : > { %806 = vrot.lane.b32.xlu1 %v2796_v9, %s2509_s18  ;;  %v628_v25 = vor.u32 %v627_v20, %v623_v19 }
  0xa9   : > { %v955_v36 = vpop.permute.xlu0 %954 }
  0xaa   : > { %v957_v41 = vpop.permute.xlu1 %956  ;;  %v1221_v46 = vsel %vm1219_vm9, %v1188_v44, %v955_v36  ;;  %v633_v35 = vsel %vm477_vm1, %v628_v25, %v632_v26  ;;  %v2264_v36 = vld [vmem:[%s2617_s17 + $0xa4] ss:$0 sps:$4 sm:$0x11]   ;;  %v741_v44 = vsel %vm702_vm0, %v739_v32, %v740_v1 }
  0xab   : > { %851 = vrot.lane.b32.xlu0 %v597_v4, %s2513_s22  ;;  %v1223_v57 = vsel %vm1219_vm9, %v1190_v56, %v957_v41  ;;  %v621_v4 = vsel %vm477_vm1, %v616_v59, %v620_v61  ;;  %v642_v51 = vshll.u32 %v2264_v36, 16  ;;  %v743_v7 = vrot.slane %v2264_v36, 1 }
  0xac   : > { %853 = vrot.lane.b32.xlu1 %v609_v37, %s2513_s22 }
  0xad   : > { %v990_v47 = vpop.permute.xlu0 %989  ;;  %v644_v61 = vrot.slane %v642_v51, 1 }
  0xae   : > { %v675_v53 = vpop.permute.xlu1 %674  ;;  %v1254_v54 = vsel %vm1252_vm10, %v1221_v46, %v990_v47 }
  0xaf   : > { %886 = vrot.lane.b32.xlu0 %v732_v11, %s2510_s19  ;;  %2126 = vmatprep.mubr.msk.bf16.mxu0 %vm1312_vm11, %v1254_v54  ;;  %v1027_v29 = vsel %vm1021_vm3, %v2620_v0, %v675_v53 }
  0xb0   : > { %888 = vrot.lane.b32.xlu1 %v735_v45, %s2510_s19 }
  0xb1   : > { %v992_v58 = vpop.permute.xlu0 %991 }
  0xb2   : > { %v677_v62 = vpop.permute.xlu1 %676  ;;  %v1256_v63 = vsel %vm1252_vm10, %v1223_v57, %v992_v58 }
  0xb3   : > { %923 = vrot.lane.b32.xlu0 %v2796_v9, %s2514_s8  ;;  %2127 = vmatmul.mubr.msk.bf16.vlgmr.msra.gmra.mrb[0].mxu0 %vm1312_vm11, %v1256_v63  ;;  %v1029_v40 = vsel %vm1021_vm3, %v2649_v30, %v677_v62 }
  0xb4   : > { %925 = vrot.lane.b32.xlu1 %v2814_v28, %s2514_s8 }
  0xb5   : > { %v756_v2 = vpop.permute.xlu0 %755 }
  0xb6   : > { %v758_v5 = vpop.permute.xlu1 %757  ;;  %v1060_v31 = vsel %vm1054_vm4, %v1027_v29, %v756_v2  ;;  %v2925_v29 = vld [vmem:[%s2617_s17 + $0xb4] sm:$0xff]  }
  0xb7   : > { %970 = vrot.lane.b32.xlu0 %v609_v37, %s2515_s15  ;;  %v1062_v42 = vsel %vm1054_vm4, %v1029_v40, %v758_v5 }
  0xb8   : > { %972 = vrot.lane.b32.xlu1 %v621_v4, %s2515_s15 }
  0xb9   : > { %v793_v8 = vpop.permute.xlu0 %792 }
  0xba   : > { %v795_v11 = vpop.permute.xlu1 %794  ;;  %v1093_v33 = vsel %vm1087_vm5, %v1060_v31, %v793_v8 }
  0xbb   : > { %1005 = vrot.lane.b32.xlu0 %v735_v45, %s2516_s29  ;;  %v1095_v46 = vsel %vm1087_vm5, %v1062_v42, %v795_v11  ;;  %v2912_v11 = vld [vmem:[%s2617_s17 + $0xa8] sm:$0xff]  }
  0xbc   : > { %690 = vrot.lane.b32.xlu1 %v609_v37, %s2512_s21  ;;  %v637_v37 = vshll.u32 %v2867_v27, 16  ;;  %v647_v20 = vshrl.u32 %v2912_v11, 16 }
  0xbd   : > { %v840_v13 = vpop.permute.xlu0 %839 }
  0xbe   : > { %v842_v17 = vpop.permute.xlu1 %841  ;;  %v1126_v0 = vsel %vm1120_vm6, %v1093_v33, %v840_v13  ;;  %v639_v30 = vrot.slane %v637_v37, 1  ;;  %v744_v13 = vsel %vm702_vm0, %v742_v6, %v743_v7  ;;  %v745_v33 = vrot.slane %v2912_v11, 1 }
  0xbf   : > { %1007 = vrot.lane.b32.xlu0 %v738_v12, %s2516_s29  ;;  %v1128_v52 = vsel %vm1120_vm6, %v1095_v46, %v842_v17  ;;  %v649_v17 = vshll.u32 %v2912_v11, 16  ;;  %v659_v46 = vshrl.u32 %v2925_v29, 16  ;;  %v748_v6 = vrot.slane %v2925_v29, 1 }
  0xc0   : > { %692 = vrot.lane.b32.xlu1 %v621_v4, %s2512_s21 }
  0xc1   : > { %v875_v18 = vpop.permute.xlu0 %874  ;;  %v651_v21 = vrot.slane %v649_v17, 1  ;;  %v2270_v17 = vld [vmem:[%s2617_s17 + $0xc8] ss:$0 sps:$4 sm:$0x11]  }
  0xc2   : > { %v877_v22 = vpop.permute.xlu1 %876  ;;  %v1159_v41 = vsel %vm1153_vm7, %v1126_v0, %v875_v18  ;;  %v2268_v0 = vld [vmem:[%s2617_s17 + $0xbc] ss:$0 sps:$4 sm:$0x11]  }
  0xc3   : > { %771 = vrot.lane.b32.xlu0 %v735_v45, %s2511_s20  ;;  %v635_v45 = vshrl.u32 %v2867_v27, 16  ;;  %v1161_v55 = vsel %vm1153_vm7, %v1128_v52, %v877_v22  ;;  %v654_v22 = vshll.u32 %v2266_v16, 16  ;;  %v652_v26 = vor.u32 %v651_v21, %v647_v20 }
  0xc4   : > { %773 = vrot.lane.b32.xlu1 %v738_v12, %s2511_s20  ;;  %v666_v51 = vshll.u32 %v2268_v0, 16  ;;  %v749_v7 = vrot.slane %v2268_v0, 1 }
  0xc5   : > { %v912_v24 = vpop.permute.xlu0 %911  ;;  %v640_v59 = vor.u32 %v639_v30, %v635_v45 }
  0xc6   : > { %v914_v3 = vpop.permute.xlu1 %913  ;;  %v1192_v43 = vsel %vm1186_vm8, %v1159_v41, %v912_v24 }
  0xc7   : > { %808 = vrot.lane.b32.xlu0 %v2814_v28, %s2509_s18  ;;  %v1194_v56 = vsel %vm1186_vm8, %v1161_v55, %v914_v3  ;;  %v656_v3 = vrot.slane %v654_v22, 1 }
  0xc8   : > { %810 = vrot.lane.b32.xlu1 %v2854_v10, %s2509_s18 }
  0xc9   : > { %v959_v34 = vpop.permute.xlu0 %958  ;;  %v657_v37 = vsel %vm477_vm1, %v652_v26, %v656_v3 }
  0xca   : > { %v961_v38 = vpop.permute.xlu1 %960  ;;  %v1225_v47 = vsel %vm1219_vm9, %v1192_v43, %v959_v34  ;;  %v746_v34 = vrot.slane %v2266_v16, 1 }
  0xcb   : > { %855 = vrot.lane.b32.xlu0 %v621_v4, %s2513_s22  ;;  %v1227_v57 = vsel %vm1219_vm9, %v1194_v56, %v961_v38  ;;  %v645_v4 = vsel %vm477_vm1, %v640_v59, %v644_v61  ;;  %v661_v38 = vshll.u32 %v2925_v29, 16  ;;  %v668_v61 = vrot.slane %v666_v51, 1 }
  0xcc   : > { %857 = vrot.lane.b32.xlu1 %v633_v35, %s2513_s22  ;;  %v747_v45 = vsel %vm702_vm0, %v745_v33, %v746_v34 }
  0xcd   : > { %v994_v50 = vpop.permute.xlu0 %993 }
  0xce   : > { %v679_v53 = vpop.permute.xlu1 %678  ;;  %v1258_v54 = vsel %vm1252_vm10, %v1225_v47, %v994_v50 }
  0xcf   : > { %890 = vrot.lane.b32.xlu0 %v738_v12, %s2510_s19  ;;  %2130 = vmatprep.mubr.msk.bf16.mxu0 %vm1312_vm11, %v1258_v54  ;;  %v1031_v32 = vsel %vm1021_vm3, %v2679_v49, %v679_v53 }
  0xd0   : > { %892 = vrot.lane.b32.xlu1 %v741_v44, %s2510_s19 }
  0xd1   : > { %v996_v58 = vpop.permute.xlu0 %995 }
  0xd2   : > { %v681_v62 = vpop.permute.xlu1 %680  ;;  %v1260_v63 = vsel %vm1252_vm10, %v1227_v57, %v996_v58 }
  0xd3   : > { %927 = vrot.lane.b32.xlu0 %v2854_v10, %s2514_s8  ;;  %2131 = vmatmul.mubr.msk.bf16.gmra.mrb[4].mxu0 %vm1312_vm11, %v1260_v63  ;;  %v1033_v41 = vsel %vm1021_vm3, %v2695_v60, %v681_v62  ;;  %v663_v60 = vrot.slane %v661_v38, 1 }
  0xd4   : > { %929 = vrot.lane.b32.xlu1 %v2867_v27, %s2514_s8 }
  0xd5   : > { %v760_v2 = vpop.permute.xlu0 %759  ;;  %v664_v59 = vor.u32 %v663_v60, %v659_v46 }
  0xd6   : > { %v762_v5 = vpop.permute.xlu1 %761  ;;  %v1064_v1 = vsel %vm1054_vm4, %v1031_v32, %v760_v2  ;;  %v2271_v32 = vld [vmem:[%s2617_s17 + $0xcc] sm:$0xff]  }
  0xd7   : > { %974 = vrot.lane.b32.xlu0 %v633_v35, %s2515_s15  ;;  %v1066_v43 = vsel %vm1054_vm4, %v1033_v41, %v762_v5 }
  0xd8   : > { %976 = vrot.lane.b32.xlu1 %v645_v4, %s2515_s15 }
  0xd9   : > { %v797_v8 = vpop.permute.xlu0 %796 }
  0xda   : > { %v799_v12 = vpop.permute.xlu1 %798 }
  0xdb   : > { %1009 = vrot.lane.b32.xlu0 %v741_v44, %s2516_s29  ;;  %v1099_v47 = vsel %vm1087_vm5, %v1066_v43, %v799_v12  ;;  %v2970_v12 = vld [vmem:[%s2617_s17 + $0xc0] sm:$0xff]  }
  0xdc   : > { %694 = vrot.lane.b32.xlu1 %v633_v35, %s2512_s21  ;;  %v1097_v35 = vsel %vm1087_vm5, %v1064_v1, %v797_v8  ;;  %v824_v21 = vshrl.u32 %v2970_v12, 16 }
  0xdd   : > { %v844_v15 = vpop.permute.xlu0 %843 }
  0xde   : > { %v846_v18 = vpop.permute.xlu1 %845  ;;  %v1130_v49 = vsel %vm1120_vm6, %v1097_v35, %v844_v15  ;;  %v750_v15 = vsel %vm702_vm0, %v748_v6, %v749_v7  ;;  %v867_v35 = vrot.slane %v2970_v12, 1 }
  0xdf   : > { %1011 = vrot.lane.b32.xlu0 %v744_v13, %s2516_s29  ;;  %v1132_v52 = vsel %vm1120_vm6, %v1099_v47, %v846_v18  ;;  %v826_v18 = vshll.u32 %v2970_v12, 16  ;;  %v943_v47 = vshrl.u32 %v2271_v32, 16 }
  0xe0   : > { %696 = vrot.lane.b32.xlu1 %v645_v4, %s2512_s21 }
  0xe1   : > { %v879_v19 = vpop.permute.xlu0 %878  ;;  %v828_v22 = vrot.slane %v826_v18, 1 }
  0xe2   : > { %v881_v24 = vpop.permute.xlu1 %880  ;;  %v1163_v42 = vsel %vm1153_vm7, %v1130_v49, %v879_v19  ;;  %v2272_v49 = vld [vmem:[%s2617_s17 + $0xd4] ss:$0 sps:$4 sm:$0x11]  }
  0xe3   : > { %775 = vrot.lane.b32.xlu0 %v741_v44, %s2511_s20  ;;  %v1165_v55 = vsel %vm1153_vm7, %v1132_v52, %v881_v24  ;;  %v831_v24 = vshll.u32 %v2270_v17, 16  ;;  %v829_v3 = vor.u32 %v828_v22, %v824_v21  ;;  %v987_v6 = vrot.slane %v2272_v49, 1 }
  0xe4   : > { %777 = vrot.lane.b32.xlu1 %v744_v13, %s2511_s20 }
  0xe5   : > { %v916_v25 = vpop.permute.xlu0 %915 }
  0xe6   : > { %v918_v31 = vpop.permute.xlu1 %917  ;;  %v1196_v44 = vsel %vm1186_vm8, %v1163_v42, %v916_v25 }
  0xe7   : > { %812 = vrot.lane.b32.xlu0 %v2867_v27, %s2509_s18  ;;  %v1198_v56 = vsel %vm1186_vm8, %v1165_v55, %v918_v31  ;;  %v833_v31 = vrot.slane %v831_v24, 1 }
  0xe8   : > { %814 = vrot.lane.b32.xlu1 %v2912_v11, %s2509_s18 }
  0xe9   : > { %v963_v36 = vpop.permute.xlu0 %962  ;;  %v834_v38 = vsel %vm477_vm1, %v829_v3, %v833_v31 }
  0xea   : > { %v965_v40 = vpop.permute.xlu1 %964  ;;  %v1229_v50 = vsel %vm1219_vm9, %v1196_v44, %v963_v36  ;;  %v868_v36 = vrot.slane %v2270_v17, 1 }
  0xeb   : > { %859 = vrot.lane.b32.xlu0 %v645_v4, %s2513_s22  ;;  %v1231_v57 = vsel %vm1219_vm9, %v1198_v56, %v965_v40  ;;  %v669_v4 = vsel %vm477_vm1, %v664_v59, %v668_v61  ;;  %v945_v40 = vshll.u32 %v2271_v32, 16 }
  0xec   : > { %861 = vrot.lane.b32.xlu1 %v657_v37, %s2513_s22  ;;  %v869_v46 = vsel %vm702_vm0, %v867_v35, %v868_v36 }
  0xed   : > { %v998_v30 = vpop.permute.xlu0 %997  ;;  %v947_v51 = vrot.slane %v945_v40, 1 }
  0xee   : > { %v683_v53 = vpop.permute.xlu1 %682  ;;  %v1262_v54 = vsel %vm1252_vm10, %v1229_v50, %v998_v30 }
  0xef   : > { %894 = vrot.lane.b32.xlu0 %v744_v13, %s2510_s19  ;;  %2134 = vmatprep.mubr.msk.bf16.mxu0 %vm1312_vm11, %v1262_v54  ;;  %v1035_v33 = vsel %vm1021_vm3, %v2720_v14, %v683_v53  ;;  %v948_v59 = vor.u32 %v947_v51, %v943_v47 }
  0xf0   : > { %896 = vrot.lane.b32.xlu1 %v747_v45, %s2510_s19 }
  0xf1   : > { %v1000_v58 = vpop.permute.xlu0 %999 }
  0xf2   : > { %v685_v62 = vpop.permute.xlu1 %684  ;;  %v1264_v63 = vsel %vm1252_vm10, %v1231_v57, %v1000_v58 }
  0xf3   : > { %931 = vrot.lane.b32.xlu0 %v2912_v11, %s2514_s8  ;;  %2135 = vmatmul.mubr.msk.bf16.gmra.mrb[8].mxu0 %vm1312_vm11, %v1264_v63  ;;  %v1037_v42 = vsel %vm1021_vm3, %v2733_v23, %v685_v62  ;;  %v950_v23 = vshll.u32 %v2272_v49, 16 }
  0xf4   : > { %933 = vrot.lane.b32.xlu1 %v2925_v29, %s2514_s8 }
  0xf5   : > { %v764_v2 = vpop.permute.xlu0 %763  ;;  %v952_v61 = vrot.slane %v950_v23, 1 }
  0xf6   : > { %v766_v5 = vpop.permute.xlu1 %765  ;;  %v1068_v34 = vsel %vm1054_vm4, %v1035_v33, %v764_v2 }
  0xf7   : > { %978 = vrot.lane.b32.xlu0 %v657_v37, %s2515_s15  ;;  %v1070_v44 = vsel %vm1054_vm4, %v1037_v42, %v766_v5  ;;  %v986_v5 = vrot.slane %v2271_v32, 1 }
  0xf8   : > { %980 = vrot.lane.b32.xlu1 %v669_v4, %s2515_s15 }
  0xf9   : > { %v801_v8 = vpop.permute.xlu0 %800 }
  0xfa   : > { %v803_v13 = vpop.permute.xlu1 %802 }
  0xfb   : > { %1013 = vrot.lane.b32.xlu0 %v747_v45, %s2516_s29  ;;  %v1103_v50 = vsel %vm1087_vm5, %v1070_v44, %v803_v13  ;;  %v988_v13 = vsel %vm702_vm0, %v986_v5, %v987_v6 }
  0xfc   : > { %698 = vrot.lane.b32.xlu1 %v657_v37, %s2512_s21  ;;  %v1101_v37 = vsel %vm1087_vm5, %v1068_v34, %v801_v8 }
  0xfd   : > { %v848_v16 = vpop.permute.xlu0 %847 }
  0xfe   : > { %v850_v19 = vpop.permute.xlu1 %849  ;;  %v1134_v14 = vsel %vm1120_vm6, %v1101_v37, %v848_v16 }
  0xff   : > { %1015 = vrot.lane.b32.xlu0 %v750_v15, %s2516_s29  ;;  %v1136_v52 = vsel %vm1120_vm6, %v1103_v50, %v850_v19 }
 0x100   : > { %700 = vrot.lane.b32.xlu1 %v669_v4, %s2512_s21 }
 0x101   : > { %v883_v20 = vpop.permute.xlu0 %882 }
 0x102   : > { %v885_v25 = vpop.permute.xlu1 %884  ;;  %v1167_v43 = vsel %vm1153_vm7, %v1134_v14, %v883_v20 }
 0x103   : > { %779 = vrot.lane.b32.xlu0 %v747_v45, %s2511_s20  ;;  %v1169_v55 = vsel %vm1153_vm7, %v1136_v52, %v885_v25 }
 0x104   : > { %781 = vrot.lane.b32.xlu1 %v750_v15, %s2511_s20  ;;  %s2519_s20 = smov [#allocation2]  }
 0x105   : > { %v920_v26 = vpop.permute.xlu0 %919  ;;  %s2417_s21 = sshll.u32 %s2519_s20, 4  ;;  %s2418_s21 = int_to_ptr.vmem [resolvable:$false] %s2417_s21 }
 0x106   : > { %v922_v1 = vpop.permute.xlu1 %921  ;;  %v1200_v45 = vsel %vm1186_vm8, %v1167_v43, %v920_v26 }
 0x107   : > { %816 = vrot.lane.b32.xlu0 %v2925_v29, %s2509_s18  ;;  %v1202_v56 = vsel %vm1186_vm8, %v1169_v55, %v922_v1 }
 0x108   : > { %818 = vrot.lane.b32.xlu1 %v2970_v12, %s2509_s18 }
 0x109   : > { %v967_v0 = vpop.permute.xlu0 %966 }
 0x10a   : > { %v969_v41 = vpop.permute.xlu1 %968  ;;  %v1233_v30 = vsel %vm1219_vm9, %v1200_v45, %v967_v0 }
 0x10b   : > { %863 = vrot.lane.b32.xlu0 %v669_v4, %s2513_s22  ;;  %v1235_v57 = vsel %vm1219_vm9, %v1202_v56, %v969_v41  ;;  %v953_v4 = vsel %vm477_vm1, %v948_v59, %v952_v61 }
 0x10c   : > { %865 = vrot.lane.b32.xlu1 %v834_v38, %s2513_s22  ;;  %s3190_s22 = sand.u32 1, %s2499_s25  }
 0x10d   : > { %v1002_v60 = vpop.permute.xlu0 %1001  ;;  %s274_s14 = scalar_lea.vmem [#allocation2], %s3190_s22  ;;  %s1882_s18 = scalar_lea.sflag [#allocation3], %s3190_s22 }
 0x10e   : > { %v687_v53 = vpop.permute.xlu1 %686  ;;  %v1266_v54 = vsel %vm1252_vm10, %v1233_v30, %v1002_v60  ;;  %s1901_s16 = sshll.u32 %s274_s14, 4  ;;  %s1902_s16 = int_to_ptr.vmem [resolvable:$true] %s1901_s16 }
 0x10f   : > { %898 = vrot.lane.b32.xlu0 %v750_v15, %s2510_s19  ;;  %2138 = vmatprep.mubr.msk.bf16.mxu0 %vm1312_vm11, %v1266_v54  ;;  %v1039_v21 = vsel %vm1021_vm3, %v2758_v39, %v687_v53  ;;  %p2420_p0 = scmp.lt.s32.totalorder %s1902_s16, %s2418_s21 }
 0x110   : > { %900 = vrot.lane.b32.xlu1 %v869_v46, %s2510_s19  ;;  %s2413_s19 = scalar_lea.vmem %s1902_s16, 16 }
 0x111   : > { %v1004_v58 = vpop.permute.xlu0 %1003  ;;  %p2414_p11 = scmp.ne.s32.totalorder %s1902_s16, %s2413_s19 }
 0x112   : > { %v689_v62 = vpop.permute.xlu1 %688  ;;  %v1268_v63 = vsel %vm1252_vm10, %v1235_v57, %v1004_v58 }
 0x113   : > { %935 = vrot.lane.b32.xlu0 %v2970_v12, %s2514_s8  ;;  %2139 = vmatmul.mubr.msk.bf16.gmra.mrb[12].mxu0 %vm1312_vm11, %v1268_v63  ;;  %v1041_v31 = vsel %vm1021_vm3, %v2771_v48, %v689_v62  ;;  %p2415_p12 = pnand %p2414_p11, %p2599_p5 }
 0x114   : > { %937 = vrot.lane.b32.xlu1 %v2271_v32, %s2514_s8  ;;  %s2419_s8 = scalar_lea.vmem %s2418_s21, 32 }
 0x115   : > { %v768_v2 = vpop.permute.xlu0 %767  ;;  %p2416_p13 = pneg %p2415_p12  ;;  %p2421_p1 = scmp.lt.s32.totalorder %s2419_s8, %s2413_s19 }
 0x116   : > { %v770_v7 = vpop.permute.xlu1 %769  ;;  %v1072_v22 = vsel %vm1054_vm4, %v1039_v21, %v768_v2 }
 0x117   : > { %982 = vrot.lane.b32.xlu0 %v834_v38, %s2515_s15  ;;  %v1074_v1 = vsel %vm1054_vm4, %v1041_v31, %v770_v7  ;;  %p2422_p2 = por %p2421_p1, %p2420_p0 }
 0x118   : > { %984 = vrot.lane.b32.xlu1 %v953_v4, %s2515_s15  ;;  %s2088_s15 = sshll.u32 %s2582_s28, 4 }
 0x119   : > { %v805_v8 = vpop.permute.xlu0 %804  ;;  %s3208_s17 = scalar_lea.hbm %s3281_s5, %s2088_s15  ;;  %p2423_p3 = pnand %p2422_p2, %p2416_p13 }
 0x11a   : > { %v807_v15 = vpop.permute.xlu1 %806  ;;  %v1105_v24 = vsel %vm1087_vm5, %v1072_v22, %v805_v8 }
 0x11b   : > { %1017 = vrot.lane.b32.xlu0 %v869_v46, %s2516_s29  ;;  %v1107_v34 = vsel %vm1087_vm5, %v1074_v1, %v807_v15 }
 0x11c   : > { %1019 = vrot.lane.b32.xlu1 %v988_v13, %s2516_s29 }
 0x11d   : > { %v852_v12 = vpop.permute.xlu0 %851 }
 0x11e   : > { %v854_v16 = vpop.permute.xlu1 %853  ;;  %v1138_v26 = vsel %vm1120_vm6, %v1105_v24, %v852_v12 }
 0x11f   : > { %v1140_v36 = vsel %vm1120_vm6, %v1107_v34, %v854_v16 }
 0x121   : > { %v887_v17 = vpop.permute.xlu0 %886 }
 0x122   : > { %v889_v18 = vpop.permute.xlu1 %888  ;;  %v1171_v32 = vsel %vm1153_vm7, %v1138_v26, %v887_v17 }
 0x123   : > { %v1173_v38 = vsel %vm1153_vm7, %v1140_v36, %v889_v18 }
 0x125   : > { %v924_v19 = vpop.permute.xlu0 %923 }
 0x126   : > { %v926_v20 = vpop.permute.xlu1 %925  ;;  %v1204_v33 = vsel %vm1186_vm8, %v1171_v32, %v924_v19 }
 0x127   : > { %v1206_v48 = vsel %vm1186_vm8, %v1173_v38, %v926_v20 }
 0x129   : > { %v971_v25 = vpop.permute.xlu0 %970 }
 0x12a   : > { %v973_v3 = vpop.permute.xlu1 %972  ;;  %v1237_v39 = vsel %vm1219_vm9, %v1204_v33, %v971_v25 }
 0x12b   : > { %v1239_v49 = vsel %vm1219_vm9, %v1206_v48, %v973_v3 }
 0x12d   : > { %v1006_v35 = vpop.permute.xlu0 %1005 }
 0x12e   : > { %v691_v37 = vpop.permute.xlu1 %690  ;;  %v1270_v0 = vsel %vm1252_vm10, %v1237_v39, %v1006_v35 }
 0x12f   : > { %2142 = vmatprep.mubr.msk.bf16.mxu0 %vm1312_vm11, %v1270_v0  ;;  %v1043_v23 = vsel %vm1021_vm3, %v2796_v9, %v691_v37 }
 0x131   : > { %v1008_v40 = vpop.permute.xlu0 %1007 }
 0x132   : > { %v693_v14 = vpop.permute.xlu1 %692  ;;  %v1272_v41 = vsel %vm1252_vm10, %v1239_v49, %v1008_v40 }
 0x133   : > { %2143 = vmatmul.mubr.msk.bf16.gmra.mrb[16].mxu0 %vm1312_vm11, %v1272_v41  ;;  %v1045_v57 = vsel %vm1021_vm3, %v2814_v28, %v693_v14 }
 0x135   : > { %v772_v42 = vpop.permute.xlu0 %771 }
 0x136   : > { %v774_v43 = vpop.permute.xlu1 %773  ;;  %v1076_v52 = vsel %vm1054_vm4, %v1043_v23, %v772_v42  ;;  %v3087_v23 = vld [vmem:[%s3278_s2] ss:$0 sm:$0xff] }
 0x137   : > { %v1078_v59 = vsel %vm1054_vm4, %v1045_v57, %v774_v43 }
 0x139   : > { %v809_v44 = vpop.permute.xlu0 %808 }
 0x13a   : > { %v811_v45 = vpop.permute.xlu1 %810  ;;  %v1109_v53 = vsel %vm1087_vm5, %v1076_v52, %v809_v44 }
 0x13b   : > { %v1111_v62 = vsel %vm1087_vm5, %v1078_v59, %v811_v45 }
 0x13d   : > { %v856_v46 = vpop.permute.xlu0 %855 }
 0x13e   : > { %v858_v47 = vpop.permute.xlu1 %857  ;;  %v1142_v55 = vsel %vm1120_vm6, %v1109_v53, %v856_v46 }
 0x13f   : > { %v1144_v2 = vsel %vm1120_vm6, %v1111_v62, %v858_v47 }
 0x141   : > { %v891_v50 = vpop.permute.xlu0 %890 }
 0x142   : > { %v893_v30 = vpop.permute.xlu1 %892  ;;  %v1175_v58 = vsel %vm1153_vm7, %v1142_v55, %v891_v50 }
 0x143   : > { %v1177_v6 = vsel %vm1153_vm7, %v1144_v2, %v893_v30 }
 0x145   : > { %v928_v60 = vpop.permute.xlu0 %927 }
 0x146   : > { %v930_v51 = vpop.permute.xlu1 %929  ;;  %v1208_v61 = vsel %vm1186_vm8, %v1175_v58, %v928_v60 }
 0x147   : > { %v1210_v28 = vsel %vm1186_vm8, %v1177_v6, %v930_v51 }
 0x149   : > { %v975_v54 = vpop.permute.xlu0 %974 }
 0x14a   : > { %v977_v56 = vpop.permute.xlu1 %976  ;;  %v1241_v9 = vsel %vm1219_vm9, %v1208_v61, %v975_v54 }
 0x14b   : > { %v1243_v7 = vsel %vm1219_vm9, %v1210_v28, %v977_v56 }
 0x14d   : > { %v1010_v63 = vpop.permute.xlu0 %1009 }
 0x14e   : > { %v695_v4 = vpop.permute.xlu1 %694  ;;  %v1274_v5 = vsel %vm1252_vm10, %v1241_v9, %v1010_v63 }
 0x14f   : > { %2146 = vmatprep.mubr.msk.bf16.mxu0 %vm1312_vm11, %v1274_v5  ;;  %v1047_v26 = vsel %vm1021_vm3, %v2854_v10, %v695_v4 }
 0x151   : > { %v1012_v8 = vpop.permute.xlu0 %1011 }
 0x152   : > { %v697_v13 = vpop.permute.xlu1 %696  ;;  %v1276_v15 = vsel %vm1252_vm10, %v1243_v7, %v1012_v8 }
 0x153   : > { %2147 = vmatmul.mubr.msk.bf16.gmra.mrb[20].mxu0 %vm1312_vm11, %v1276_v15  ;;  %v1049_v34 = vsel %vm1021_vm3, %v2867_v27, %v697_v13 }
 0x155   : > { %v776_v12 = vpop.permute.xlu0 %775 }
 0x156   : > { %v778_v16 = vpop.permute.xlu1 %777  ;;  %v1080_v3 = vsel %vm1054_vm4, %v1047_v26, %v776_v12 }
 0x157   : > { %v1082_v35 = vsel %vm1054_vm4, %v1049_v34, %v778_v16 }
 0x159   : > { %v813_v17 = vpop.permute.xlu0 %812 }
 0x15a   : > { %v815_v18 = vpop.permute.xlu1 %814  ;;  %v1113_v31 = vsel %vm1087_vm5, %v1080_v3, %v813_v17 }
 0x15b   : > { %v1115_v37 = vsel %vm1087_vm5, %v1082_v35, %v815_v18 }
 0x15d   : > { %v860_v19 = vpop.permute.xlu0 %859 }
 0x15e   : > { %v862_v20 = vpop.permute.xlu1 %861  ;;  %v1146_v1 = vsel %vm1120_vm6, %v1113_v31, %v860_v19 }
 0x15f   : > { %v1148_v38 = vsel %vm1120_vm6, %v1115_v37, %v862_v20 }
 0x161   : > { %v895_v21 = vpop.permute.xlu0 %894 }
 0x162   : > { %v897_v22 = vpop.permute.xlu1 %896  ;;  %v1179_v39 = vsel %vm1153_vm7, %v1146_v1, %v895_v21 }
 0x163   : > { %v1181_v40 = vsel %vm1153_vm7, %v1148_v38, %v897_v22 }
 0x165   : > { %v932_v24 = vpop.permute.xlu0 %931 }
 0x166   : > { %v934_v25 = vpop.permute.xlu1 %933  ;;  %v1212_v36 = vsel %vm1186_vm8, %v1179_v39, %v932_v24 }
 0x167   : > { %v1214_v27 = vsel %vm1186_vm8, %v1181_v40, %v934_v25 }
 0x169   : > { %v979_v32 = vpop.permute.xlu0 %978 }
 0x16a   : > { %v981_v33 = vpop.permute.xlu1 %980  ;;  %v1245_v10 = vsel %vm1219_vm9, %v1212_v36, %v979_v32 }
 0x16b   : > { %v1247_v14 = vsel %vm1219_vm9, %v1214_v27, %v981_v33 }
 0x16d   : > { %v1014_v0 = vpop.permute.xlu0 %1013 }
 0x16e   : > { %v699_v48 = vpop.permute.xlu1 %698  ;;  %v1278_v49 = vsel %vm1252_vm10, %v1245_v10, %v1014_v0 }
 0x16f   : > { %2150 = vmatprep.mubr.msk.bf16.mxu0 %vm1312_vm11, %v1278_v49  ;;  %v1051_v55 = vsel %vm1021_vm3, %v2912_v11, %v699_v48 }
 0x171   : > { %v1016_v41 = vpop.permute.xlu0 %1015 }
 0x172   : > { %v701_v42 = vpop.permute.xlu1 %700  ;;  %v1280_v43 = vsel %vm1252_vm10, %v1247_v14, %v1016_v41 }
 0x173   : > { %2151 = vmatmul.mubr.msk.bf16.gmra.mrb[24].mxu0 %vm1312_vm11, %v1280_v43  ;;  %v1053_v58 = vsel %vm1021_vm3, %v2925_v29, %v701_v42 }
 0x175   : > { %v780_v44 = vpop.permute.xlu0 %779 }
 0x176   : > { %v782_v45 = vpop.permute.xlu1 %781  ;;  %v1084_v59 = vsel %vm1054_vm4, %v1051_v55, %v780_v44 }
 0x177   : > { %v1086_v9 = vsel %vm1054_vm4, %v1053_v58, %v782_v45 }
 0x179   : > { %v817_v46 = vpop.permute.xlu0 %816 }
 0x17a   : > { %v819_v47 = vpop.permute.xlu1 %818  ;;  %v1117_v63 = vsel %vm1087_vm5, %v1084_v59, %v817_v46 }
 0x17b   : > { %v1119_v6 = vsel %vm1087_vm5, %v1086_v9, %v819_v47 }
 0x17d   : > { %v864_v50 = vpop.permute.xlu0 %863 }
 0x17e   : > { %v866_v30 = vpop.permute.xlu1 %865  ;;  %v1150_v29 = vsel %vm1120_vm6, %v1117_v63, %v864_v50 }
 0x17f   : > { %v1152_v13 = vsel %vm1120_vm6, %v1119_v6, %v866_v30 }
 0x181   : > { %v899_v60 = vpop.permute.xlu0 %898 }
 0x182   : > { %v901_v51 = vpop.permute.xlu1 %900  ;;  %v1183_v15 = vsel %vm1153_vm7, %v1150_v29, %v899_v60 }
 0x183   : > { %v1185_v17 = vsel %vm1153_vm7, %v1152_v13, %v901_v51 }
 0x185   : > { %v936_v52 = vpop.permute.xlu0 %935 }
 0x186   : > { %v938_v53 = vpop.permute.xlu1 %937  ;;  %v2128_v54 = vpop.f32.mrb[0].mxu0  ;;  %v1216_v18 = vsel %vm1186_vm8, %v1183_v15, %v936_v52 }
 0x187   : > { %v3092_v56 = vadd.f32 %v2128_v54, %v3087_v23  ;;  %v1383_v57 = vpop.f32.mrb[1].mxu0  ;;  %v1218_v21 = vsel %vm1186_vm8, %v1185_v17, %v938_v53 }
 0x188   : > { %v1384_v61 = vadd.f32 %v3087_v23, %v1383_v57  ;;  %v2129_v62 = vpop.f32.mrb[2].mxu0 }
 0x189   : > { %v1512_v2 = vsub.f32 0.0, %v3092_v56  ;;  %v3102_v11 = vadd.f32 %v2129_v62, %v3087_v23  ;;  %v1386_v4 = vpop.f32.mrb[3].mxu0  ;;  %v983_v5 = vpop.permute.xlu0 %982 }
 0x18a   : > { %v1510_v28 = vsub.f32 0.0, %v1384_v61  ;;  %v985_v7 = vpop.permute.xlu1 %984  ;;  %v1387_v8 = vadd.f32 %v3087_v23, %v1386_v4  ;;  %v1249_v24 = vsel %vm1219_vm9, %v1216_v18, %v983_v5 }
 0x18b   : > { %v1546_v12 = vmul.f32 1.442695, %v1512_v2  ;;  %v1513_v16 = vsub.f32 0.0, %v3102_v11  ;;  %v1251_v26 = vsel %vm1219_vm9, %v1218_v21, %v985_v7 }
 0x18c   : > { %v1542_v19 = vmul.f32 1.442695, %v1510_v28  ;;  %v1511_v20 = vsub.f32 0.0, %v1387_v8 }
 0x18d   : > { %2281 = vpow2.f32 %v1546_v12  ;;  %v1548_v22 = vmul.f32 1.442695, %v1513_v16  ;;  %v1018_v25 = vpop.permute.xlu0 %1017 }
 0x18e   : > { %2283 = vpow2.f32 %v1542_v19  ;;  %v1544_v3 = vmul.f32 1.442695, %v1511_v20  ;;  %v1020_v31 = vpop.permute.xlu1 %1019  ;;  %v1282_v32 = vsel %vm1252_vm10, %v1249_v24, %v1018_v25 }
 0x18f   : > { %2285 = vpow2.f32 %v1548_v22  ;;  %v1284_v1 = vsel %vm1252_vm10, %v1251_v26, %v1020_v31  ;;  %2154 = vmatprep.mubr.msk.bf16.mxu0 %vm1312_vm11, %v1282_v32 }
 0x190   : > { %2287 = vpow2.f32 %v1544_v3  ;;  %2155 = vmatmul.mubr.msk.bf16.gmra.mrb[28].mxu0 %vm1312_vm11, %v1284_v1 }
 0x197   : > { %v2282_v33 = vpop.eup %2281 }
 0x198   : > { %v2284_v34 = vpop.eup %2283  ;;  %v1608_v39 = vadd.f32 1.0, %v2282_v33 }
 0x199   : > { %v2286_v35 = vpop.eup %2285  ;;  %v1606_v36 = vadd.f32 1.0, %v2284_v34 }
 0x19a   : > { %v2288_v37 = vpop.eup %2287  ;;  %v1609_v10 = vadd.f32 1.0, %v2286_v35 }
 0x19b   : > { %2289 = vrcp.f32 %v1606_v36  ;;  %v1607_v0 = vadd.f32 1.0, %v2288_v37 }
 0x19c   : > { %2291 = vrcp.f32 %v1608_v39 }
 0x19d   : > { %2293 = vrcp.f32 %v1607_v0 }
 0x19e   : > { %2295 = vrcp.f32 %v1609_v10 }
 0x1a5   : > { %v2290_v38 = vpop.eup %2289 }
 0x1a6   : > { %v2292_v48 = vpop.eup %2291  ;;  %v2132_v49 = vpop.f32.mrb[4].mxu0  ;;  %v1670_v41 = vmul.f32 %v2290_v38, %v1384_v61 }
 0x1a7   : > { %v2294_v40 = vpop.eup %2293  ;;  %v1408_v27 = vadd.f32 %v2132_v49, %v3087_v23  ;;  %v1399_v14 = vpop.f32.mrb[5].mxu0  ;;  %v1672_v30 = vmul.f32 %v2292_v48, %v3092_v56 }
 0x1a8   : > { %v1671_v42 = vmul.f32 %v2294_v40, %v1387_v8  ;;  %v1400_v43 = vadd.f32 %v3087_v23, %v1399_v14  ;;  %v2133_v44 = vpop.f32.mrb[6].mxu0  ;;  %v2296_v45 = vpop.eup %2295 }
 0x1a9   : > { %v1516_v46 = vsub.f32 0.0, %v1408_v27  ;;  %v1411_v47 = vadd.f32 %v2133_v44, %v3087_v23  ;;  %v1402_v50 = vpop.f32.mrb[7].mxu0  ;;  %v1673_v55 = vmul.f32 %v2296_v45, %v3102_v11 }
 0x1aa   : > { %v1702_v60 = vadd.f32 %v1671_v42, %v1670_v41  ;;  %v1514_v51 = vsub.f32 0.0, %v1400_v43  ;;  %v1403_v52 = vadd.f32 %v3087_v23, %v1402_v50 }
 0x1ab   : > { %v1554_v53 = vmul.f32 1.442695, %v1516_v46  ;;  %v1517_v54 = vsub.f32 0.0, %v1411_v47 }
 0x1ac   : > { %v1703_v57 = vadd.f32 %v1702_v60, %v1672_v30  ;;  %v1550_v58 = vmul.f32 1.442695, %v1514_v51  ;;  %v1515_v59 = vsub.f32 0.0, %v1403_v52 }
 0x1ad   : > { %2297 = vpow2.f32 %v1554_v53  ;;  %v1556_v61 = vmul.f32 1.442695, %v1517_v54 }
 0x1ae   : > { %2299 = vpow2.f32 %v1550_v58  ;;  %v1704_v62 = vadd.f32 %v1703_v57, %v1673_v55  ;;  %v1552_v9 = vmul.f32 1.442695, %v1515_v59 }
 0x1af   : > { %2301 = vpow2.f32 %v1556_v61 }
 0x1b0   : > { %2303 = vpow2.f32 %v1552_v9 }
 0x1b7   : > { %v2298_v63 = vpop.eup %2297 }
 0x1b8   : > { %v2300_v56 = vpop.eup %2299  ;;  %v1612_v2 = vadd.f32 1.0, %v2298_v63 }
 0x1b9   : > { %v2302_v4 = vpop.eup %2301  ;;  %v1610_v5 = vadd.f32 1.0, %v2300_v56 }
 0x1ba   : > { %v2304_v6 = vpop.eup %2303  ;;  %v1613_v29 = vadd.f32 1.0, %v2302_v4 }
 0x1bb   : > { %2305 = vrcp.f32 %v1610_v5  ;;  %v1611_v28 = vadd.f32 1.0, %v2304_v6 }
 0x1bc   : > { %2307 = vrcp.f32 %v1612_v2 }
 0x1bd   : > { %2309 = vrcp.f32 %v1611_v28 }
 0x1be   : > { %2311 = vrcp.f32 %v1613_v29 }
 0x1c5   : > { %v2306_v11 = vpop.eup %2305 }
 0x1c6   : > { %v2308_v7 = vpop.eup %2307  ;;  %v1674_v8 = vmul.f32 %v2306_v11, %v1400_v43  ;;  %v2136_v13 = vpop.f32.mrb[8].mxu0 }
 0x1c7   : > { %v2310_v15 = vpop.eup %2309  ;;  %v1424_v12 = vadd.f32 %v2136_v13, %v3087_v23  ;;  %v1415_v16 = vpop.f32.mrb[9].mxu0  ;;  %v1676_v26 = vmul.f32 %v2308_v7, %v1408_v27 }
 0x1c8   : > { %v1705_v17 = vadd.f32 %v1704_v62, %v1674_v8  ;;  %v1675_v18 = vmul.f32 %v2310_v15, %v1403_v52  ;;  %v1416_v19 = vadd.f32 %v3087_v23, %v1415_v16  ;;  %v2137_v20 = vpop.f32.mrb[10].mxu0  ;;  %v2312_v21 = vpop.eup %2311 }
 0x1c9   : > { %v1520_v22 = vsub.f32 0.0, %v1424_v12  ;;  %v1427_v24 = vadd.f32 %v2137_v20, %v3087_v23  ;;  %v1418_v25 = vpop.f32.mrb[11].mxu0  ;;  %v1677_v34 = vmul.f32 %v2312_v21, %v1411_v47  ;;  %v2517_v20 = vmov 0.0   ;;  %v2274_v21 = vld [vmem:[%s3279_s3 + $0x8] sm:$0xff]  }
 0x1ca   : > { %v1706_v3 = vadd.f32 %v1705_v17, %v1675_v18  ;;  %v1518_v31 = vsub.f32 0.0, %v1416_v19  ;;  %v1419_v32 = vadd.f32 %v3087_v23, %v1418_v25  ;;  %2158 = vmatprep.subr.bf16.mxu1 %v2517_v20  ;;  %2174 = vmatprep.mubr.msk.bf16.mxu1 %vm2518_vm12, %v2517_v20 }
 0x1cb   : > { %v1562_v1 = vmul.f32 1.442695, %v1520_v22  ;;  %v1521_v33 = vsub.f32 0.0, %v1427_v24 }
 0x1cc   : > { %v1707_v39 = vadd.f32 %v1706_v3, %v1676_v26  ;;  %v1558_v35 = vmul.f32 1.442695, %v1518_v31  ;;  %v1519_v36 = vsub.f32 0.0, %v1419_v32 }
 0x1cd   : > { %2313 = vpow2.f32 %v1562_v1  ;;  %v1564_v37 = vmul.f32 1.442695, %v1521_v33 }
 0x1ce   : > { %2315 = vpow2.f32 %v1558_v35  ;;  %v1708_v10 = vadd.f32 %v1707_v39, %v1677_v34  ;;  %v1560_v0 = vmul.f32 1.442695, %v1519_v36 }
 0x1cf   : > { %2317 = vpow2.f32 %v1564_v37 }
 0x1d0   : > { %2319 = vpow2.f32 %v1560_v0 }
 0x1d7   : > { %v2314_v38 = vpop.eup %2313 }
 0x1d8   : > { %v2316_v48 = vpop.eup %2315  ;;  %v1616_v49 = vadd.f32 1.0, %v2314_v38  ;;  %v2276_v38 = vld [vmem:[%s3279_s3 + $0x18] sm:$0xff]  }
 0x1d9   : > { %v2318_v40 = vpop.eup %2317  ;;  %v1614_v27 = vadd.f32 1.0, %v2316_v48 }
 0x1da   : > { %v2320_v14 = vpop.eup %2319  ;;  %v1617_v41 = vadd.f32 1.0, %v2318_v40 }
 0x1db   : > { %2321 = vrcp.f32 %v1614_v27  ;;  %v1615_v42 = vadd.f32 1.0, %v2320_v14 }
 0x1dc   : > { %2323 = vrcp.f32 %v1616_v49 }
 0x1dd   : > { %2325 = vrcp.f32 %v1615_v42 }
 0x1de   : > { %2327 = vrcp.f32 %v1617_v41 }
 0x1e5   : > { %v2322_v43 = vpop.eup %2321 }
 0x1e6   : > { %v2324_v44 = vpop.eup %2323  ;;  %v1678_v45 = vmul.f32 %v2322_v43, %v1416_v19  ;;  %v2140_v46 = vpop.f32.mrb[12].mxu0  ;;  %v2273_v19 = vld [vmem:[%s3279_s3] sm:$0xff]  }
 0x1e7   : > { %v2326_v47 = vpop.eup %2325  ;;  %v3130_v50 = vadd.f32 %v2140_v46, %v3087_v23  ;;  %v1431_v30 = vpop.f32.mrb[13].mxu0  ;;  %v1680_v59 = vmul.f32 %v2324_v44, %v1424_v12  ;;  %2159 = vmatpush3.bf16.msra.mxu1 %v2273_v19 }
 0x1e8   : > { %v1709_v60 = vadd.f32 %v1708_v10, %v1678_v45  ;;  %v1679_v51 = vmul.f32 %v2326_v47, %v1419_v32  ;;  %v1432_v52 = vadd.f32 %v3087_v23, %v1431_v30  ;;  %v2141_v53 = vpop.f32.mrb[14].mxu0  ;;  %v2328_v54 = vpop.eup %2327  ;;  %2160 = vmatprep.subr.bf16.mxu1 %v2517_v20  ;;  %v2277_v47 = vld [vmem:[%s3279_s3 + $0x20] sm:$0xff]  }
 0x1e9   : > { %v1524_v55 = vsub.f32 0.0, %v3130_v50  ;;  %v3135_v57 = vadd.f32 %v2141_v53, %v3087_v23  ;;  %v1434_v58 = vpop.f32.mrb[15].mxu0  ;;  %v1681_v2 = vmul.f32 %v2328_v54, %v1427_v24  ;;  %v2275_v24 = vld [vmem:[%s3279_s3 + $0x10] sm:$0xff]   ;;  %v2280_v53 = vld [vmem:[%s3279_s3 + $0x38] sm:$0xff]  }
 0x1ea   : > { %v1710_v61 = vadd.f32 %v1709_v60, %v1679_v51  ;;  %v1522_v62 = vsub.f32 0.0, %v1432_v52  ;;  %v1435_v9 = vadd.f32 %v3087_v23, %v1434_v58  ;;  %v2278_v60 = vld [vmem:[%s3279_s3 + $0x28] sm:$0xff]   ;;  %v2279_v51 = vld [vmem:[%s3279_s3 + $0x30] sm:$0xff]  }
 0x1eb   : > { %v1570_v63 = vmul.f32 1.442695, %v1524_v55  ;;  %v1525_v56 = vsub.f32 0.0, %v3135_v57  ;;  %2161 = vmatpush3.bf16.msra.mxu1 %v2274_v21 }
 0x1ec   : > { %v1711_v4 = vadd.f32 %v1710_v61, %v1680_v59  ;;  %v1566_v5 = vmul.f32 1.442695, %v1522_v62  ;;  %v1523_v6 = vsub.f32 0.0, %v1435_v9  ;;  %2162 = vmatprep.subr.bf16.mxu1 %v2517_v20 }
 0x1ed   : > { %2329 = vpow2.f32 %v1570_v63  ;;  %v1572_v29 = vmul.f32 1.442695, %v1525_v56 }
 0x1ee   : > { %2331 = vpow2.f32 %v1566_v5  ;;  %v1712_v28 = vadd.f32 %v1711_v4, %v1681_v2  ;;  %v1568_v11 = vmul.f32 1.442695, %v1523_v6 }
 0x1ef   : > { %2333 = vpow2.f32 %v1572_v29  ;;  %2163 = vmatpush3.bf16.msra.mxu1 %v2275_v24 }
 0x1f0   : > { %2335 = vpow2.f32 %v1568_v11  ;;  %2164 = vmatprep.subr.bf16.mxu1 %v2517_v20 }
 0x1f3   : > { %2165 = vmatpush3.bf16.msra.mxu1 %v2276_v38 }
 0x1f4   : > { %2166 = vmatprep.subr.bf16.mxu1 %v2517_v20 }
 0x1f7   : > { %v2330_v7 = vpop.eup %2329  ;;  %2167 = vmatpush3.bf16.msra.mxu1 %v2277_v47 }
 0x1f8   : > { %v2332_v8 = vpop.eup %2331  ;;  %v1620_v13 = vadd.f32 1.0, %v2330_v7  ;;  %2168 = vmatprep.subr.bf16.mxu1 %v2517_v20 }
 0x1f9   : > { %v2334_v15 = vpop.eup %2333  ;;  %v1618_v12 = vadd.f32 1.0, %v2332_v8 }
 0x1fa   : > { %v2336_v16 = vpop.eup %2335  ;;  %v1621_v17 = vadd.f32 1.0, %v2334_v15 }
 0x1fb   : > { %2337 = vrcp.f32 %v1618_v12  ;;  %v1619_v18 = vadd.f32 1.0, %v2336_v16  ;;  %2169 = vmatpush3.bf16.msra.mxu1 %v2278_v60 }
 0x1fc   : > { %2339 = vrcp.f32 %v1620_v13  ;;  %2170 = vmatprep.subr.bf16.mxu1 %v2517_v20 }
 0x1fd   : > { %2341 = vrcp.f32 %v1619_v18 }
 0x1fe   : > { %2343 = vrcp.f32 %v1621_v17 }
 0x1ff   : > { %2171 = vmatpush3.bf16.msra.mxu1 %v2279_v51 }
 0x200   : > { %2172 = vmatprep.subr.bf16.mxu1 %v2517_v20 }
 0x203   : > { %2173 = vmatpush3.bf16.msra.mxu1 %v2280_v53 }
 0x205   : > { %v2338_v22 = vpop.eup %2337 }
 0x206   : > { %v2340_v25 = vpop.eup %2339  ;;  %v1682_v26 = vmul.f32 %v2338_v22, %v1432_v52  ;;  %v2144_v3 = vpop.f32.mrb[16].mxu0 }
 0x207   : > { %v2342_v31 = vpop.eup %2341  ;;  %v3149_v32 = vadd.f32 %v2144_v3, %v3087_v23  ;;  %v1447_v1 = vpop.f32.mrb[17].mxu0  ;;  %v1684_v48 = vmul.f32 %v2340_v25, %v3130_v50 }
 0x208   : > { %v1713_v33 = vadd.f32 %v1712_v28, %v1682_v26  ;;  %v1683_v34 = vmul.f32 %v2342_v31, %v1435_v9  ;;  %v1448_v39 = vadd.f32 %v3087_v23, %v1447_v1  ;;  %v2145_v35 = vpop.f32.mrb[18].mxu0  ;;  %v2344_v36 = vpop.eup %2343 }
 0x209   : > { %v1528_v37 = vsub.f32 0.0, %v3149_v32  ;;  %v3154_v10 = vadd.f32 %v2145_v35, %v3087_v23  ;;  %v1450_v0 = vpop.f32.mrb[19].mxu0  ;;  %v1685_v42 = vmul.f32 %v2344_v36, %v3135_v57 }
 0x20a   : > { %v1714_v49 = vadd.f32 %v1713_v33, %v1683_v34  ;;  %v1526_v40 = vsub.f32 0.0, %v1448_v39  ;;  %v1451_v27 = vadd.f32 %v3087_v23, %v1450_v0 }
 0x20b   : > { %v1578_v14 = vmul.f32 1.442695, %v1528_v37  ;;  %v1529_v41 = vsub.f32 0.0, %v3154_v10 }
 0x20c   : > { %v1715_v43 = vadd.f32 %v1714_v49, %v1684_v48  ;;  %v1574_v44 = vmul.f32 1.442695, %v1526_v40  ;;  %v1527_v45 = vsub.f32 0.0, %v1451_v27 }
 0x20d   : > { %2345 = vpow2.f32 %v1578_v14  ;;  %v1580_v46 = vmul.f32 1.442695, %v1529_v41 }
 0x20e   : > { %2347 = vpow2.f32 %v1574_v44  ;;  %v1716_v50 = vadd.f32 %v1715_v43, %v1685_v42  ;;  %v1576_v30 = vmul.f32 1.442695, %v1527_v45 }
 0x20f   : > { %2349 = vpow2.f32 %v1580_v46 }
 0x210   : > { %2351 = vpow2.f32 %v1576_v30 }
 0x217   : > { %v2346_v52 = vpop.eup %2345 }
 0x218   : > { %v2348_v54 = vpop.eup %2347  ;;  %v1624_v55 = vadd.f32 1.0, %v2346_v52 }
 0x219   : > { %v2350_v57 = vpop.eup %2349  ;;  %v1622_v58 = vadd.f32 1.0, %v2348_v54 }
 0x21a   : > { %v2352_v59 = vpop.eup %2351  ;;  %v1625_v61 = vadd.f32 1.0, %v2350_v57 }
 0x21b   : > { %2353 = vrcp.f32 %v1622_v58  ;;  %v1623_v62 = vadd.f32 1.0, %v2352_v59 }
 0x21c   : > { %2355 = vrcp.f32 %v1624_v55 }
 0x21d   : > { %2357 = vrcp.f32 %v1623_v62 }
 0x21e   : > { %2359 = vrcp.f32 %v1625_v61 }
 0x225   : > { %v2354_v9 = vpop.eup %2353 }
 0x226   : > { %v2356_v63 = vpop.eup %2355  ;;  %v1686_v56 = vmul.f32 %v2354_v9, %v1448_v39  ;;  %v2148_v2 = vpop.f32.mrb[20].mxu0 }
 0x227   : > { %v2358_v4 = vpop.eup %2357  ;;  %v1472_v5 = vadd.f32 %v2148_v2, %v3087_v23  ;;  %v1463_v6 = vpop.f32.mrb[21].mxu0  ;;  %v1688_v16 = vmul.f32 %v2356_v63, %v3149_v32 }
 0x228   : > { %v1717_v29 = vadd.f32 %v1716_v50, %v1686_v56  ;;  %v1687_v28 = vmul.f32 %v2358_v4, %v1451_v27  ;;  %v1464_v11 = vadd.f32 %v3087_v23, %v1463_v6  ;;  %v2149_v7 = vpop.f32.mrb[22].mxu0  ;;  %v2360_v8 = vpop.eup %2359 }
 0x229   : > { %v1532_v13 = vsub.f32 0.0, %v1472_v5  ;;  %v1475_v15 = vadd.f32 %v2149_v7, %v3087_v23  ;;  %v1466_v12 = vpop.f32.mrb[23].mxu0  ;;  %v1689_v22 = vmul.f32 %v2360_v8, %v3154_v10 }
 0x22a   : > { %v1718_v17 = vadd.f32 %v1717_v29, %v1687_v28  ;;  %v1530_v18 = vsub.f32 0.0, %v1464_v11  ;;  %v1467_v19 = vadd.f32 %v3087_v23, %v1466_v12 }
 0x22b   : > { %v1586_v20 = vmul.f32 1.442695, %v1532_v13  ;;  %v1533_v21 = vsub.f32 0.0, %v1475_v15 }
 0x22c   : > { %v1719_v24 = vadd.f32 %v1718_v17, %v1688_v16  ;;  %v1582_v25 = vmul.f32 1.442695, %v1530_v18  ;;  %v1531_v26 = vsub.f32 0.0, %v1467_v19 }
 0x22d   : > { %2361 = vpow2.f32 %v1586_v20  ;;  %v1588_v3 = vmul.f32 1.442695, %v1533_v21 }
 0x22e   : > { %2363 = vpow2.f32 %v1582_v25  ;;  %v1720_v31 = vadd.f32 %v1719_v24, %v1689_v22  ;;  %v1584_v1 = vmul.f32 1.442695, %v1531_v26 }
 0x22f   : > { %2365 = vpow2.f32 %v1588_v3 }
 0x230   : > { %2367 = vpow2.f32 %v1584_v1 }
 0x237   : > { %v2362_v33 = vpop.eup %2361 }
 0x238   : > { %v2364_v32 = vpop.eup %2363  ;;  %v1628_v34 = vadd.f32 1.0, %v2362_v33 }
 0x239   : > { %v2366_v39 = vpop.eup %2365  ;;  %v1626_v35 = vadd.f32 1.0, %v2364_v32 }
 0x23a   : > { %v2368_v36 = vpop.eup %2367  ;;  %v1629_v37 = vadd.f32 1.0, %v2366_v39 }
 0x23b   : > { %2369 = vrcp.f32 %v1626_v35  ;;  %v1627_v0 = vadd.f32 1.0, %v2368_v36 }
 0x23c   : > { %2371 = vrcp.f32 %v1628_v34 }
 0x23d   : > { %2373 = vrcp.f32 %v1627_v0 }
 0x23e   : > { %2375 = vrcp.f32 %v1629_v37 }
 0x245   : > { %v2370_v10 = vpop.eup %2369 }
 0x246   : > { %v2372_v38 = vpop.eup %2371  ;;  %v1690_v48 = vmul.f32 %v2370_v10, %v1464_v11  ;;  %v2152_v49 = vpop.f32.mrb[24].mxu0 }
 0x247   : > { %v2374_v40 = vpop.eup %2373  ;;  %v1488_v27 = vadd.f32 %v2152_v49, %v3087_v23  ;;  %v1479_v14 = vpop.f32.mrb[25].mxu0  ;;  %v1692_v30 = vmul.f32 %v2372_v38, %v1472_v5 }
 0x248   : > { %v1721_v41 = vadd.f32 %v1720_v31, %v1690_v48  ;;  %v1691_v42 = vmul.f32 %v2374_v40, %v1467_v19  ;;  %v1480_v43 = vadd.f32 %v3087_v23, %v1479_v14  ;;  %v2153_v44 = vpop.f32.mrb[26].mxu0  ;;  %v2376_v45 = vpop.eup %2375 }
 0x249   : > { %v1536_v46 = vsub.f32 0.0, %v1488_v27  ;;  %v1491_v47 = vadd.f32 %v2153_v44, %v3087_v23  ;;  %v1482_v50 = vpop.f32.mrb[27].mxu0  ;;  %v1693_v55 = vmul.f32 %v2376_v45, %v1475_v15 }
 0x24a   : > { %v1722_v60 = vadd.f32 %v1721_v41, %v1691_v42  ;;  %v1534_v51 = vsub.f32 0.0, %v1480_v43  ;;  %v1483_v52 = vadd.f32 %v3087_v23, %v1482_v50 }
 0x24b   : > { %v1594_v53 = vmul.f32 1.442695, %v1536_v46  ;;  %v1537_v54 = vsub.f32 0.0, %v1491_v47 }
 0x24c   : > { %v1723_v57 = vadd.f32 %v1722_v60, %v1692_v30  ;;  %v1590_v58 = vmul.f32 1.442695, %v1534_v51  ;;  %v1535_v59 = vsub.f32 0.0, %v1483_v52 }
 0x24d   : > { %2377 = vpow2.f32 %v1594_v53  ;;  %v1596_v61 = vmul.f32 1.442695, %v1537_v54 }
 0x24e   : > { %2379 = vpow2.f32 %v1590_v58  ;;  %v1724_v62 = vadd.f32 %v1723_v57, %v1693_v55  ;;  %v1592_v9 = vmul.f32 1.442695, %v1535_v59 }
 0x24f   : > { %2381 = vpow2.f32 %v1596_v61 }
 0x250   : > { %2383 = vpow2.f32 %v1592_v9 }
 0x257   : > { %v2378_v63 = vpop.eup %2377 }
 0x258   : > { %v2380_v56 = vpop.eup %2379  ;;  %v1632_v2 = vadd.f32 1.0, %v2378_v63  ;;  %v1757_v63 = vld [vmem:[%s3280_s4] sm:$0x1] }
 0x259   : > { %v2382_v4 = vpop.eup %2381  ;;  %v1630_v5 = vadd.f32 1.0, %v2380_v56 }
 0x25a   : > { %v2384_v6 = vpop.eup %2383  ;;  %v1633_v29 = vadd.f32 1.0, %v2382_v4 }
 0x25b   : > { %2385 = vrcp.f32 %v1630_v5  ;;  %v1631_v28 = vadd.f32 1.0, %v2384_v6 }
 0x25c   : > { %2387 = vrcp.f32 %v1632_v2 }
 0x25d   : > { %2389 = vrcp.f32 %v1631_v28  ;;  %v1860_v28 = vlaneseq }
 0x25e   : > { %2391 = vrcp.f32 %v1633_v29 }
 0x263   : > { %v2156_v11 = vpop.f32.mrb[28].mxu0 }
 0x264   : > { %v1504_v7 = vadd.f32 %v2156_v11, %v3087_v23  ;;  %v1495_v8 = vpop.f32.mrb[29].mxu0  ;;  %v1861_v11 = vand.u32 127, %v1860_v28 }
 0x265   : > { %v2386_v13 = vpop.eup %2385  ;;  %v1496_v15 = vadd.f32 %v3087_v23, %v1495_v8  ;;  %v2157_v12 = vpop.f32.mrb[30].mxu0 }
 0x266   : > { %v2388_v16 = vpop.eup %2387  ;;  %v1694_v17 = vmul.f32 %v2386_v13, %v1480_v43  ;;  %v1540_v18 = vsub.f32 0.0, %v1504_v7  ;;  %v1507_v19 = vadd.f32 %v2157_v12, %v3087_v23  ;;  %v1498_v20 = vpop.f32.mrb[31].mxu0 }
 0x267   : > { %v2390_v21 = vpop.eup %2389  ;;  %v1538_v22 = vsub.f32 0.0, %v1496_v15  ;;  %v1499_v24 = vadd.f32 %v3087_v23, %v1498_v20  ;;  %v1696_v34 = vmul.f32 %v2388_v16, %v1488_v27 }
 0x268   : > { %v1725_v25 = vadd.f32 %v1724_v62, %v1694_v17  ;;  %v1695_v26 = vmul.f32 %v2390_v21, %v1483_v52  ;;  %v1602_v3 = vmul.f32 1.442695, %v1540_v18  ;;  %v1541_v31 = vsub.f32 0.0, %v1507_v19  ;;  %v2392_v1 = vpop.eup %2391 }
 0x269   : > { %v1598_v33 = vmul.f32 1.442695, %v1538_v22  ;;  %v1539_v32 = vsub.f32 0.0, %v1499_v24  ;;  %v1697_v37 = vmul.f32 %v2392_v1, %v1491_v47 }
 0x26a   : > { %v1726_v39 = vadd.f32 %v1725_v25, %v1695_v26  ;;  %2393 = vpow2.f32 %v1602_v3  ;;  %v1604_v35 = vmul.f32 1.442695, %v1541_v31 }
 0x26b   : > { %2395 = vpow2.f32 %v1598_v33  ;;  %v1600_v36 = vmul.f32 1.442695, %v1539_v32 }
 0x26c   : > { %v1727_v0 = vadd.f32 %v1726_v39, %v1696_v34  ;;  %2397 = vpow2.f32 %v1604_v35 }
 0x26d   : > { %2399 = vpow2.f32 %v1600_v36 }
 0x26e   : > { %v1728_v10 = vadd.f32 %v1727_v0, %v1697_v37 }
 0x274   : > { %v2394_v38 = vpop.eup %2393 }
 0x275   : > { %v2396_v23 = vpop.eup %2395  ;;  %v1636_v48 = vadd.f32 1.0, %v2394_v38 }
 0x276   : > { %v2398_v49 = vpop.eup %2397  ;;  %v1634_v40 = vadd.f32 1.0, %v2396_v23 }
 0x277   : > { %v2400_v14 = vpop.eup %2399  ;;  %v1637_v41 = vadd.f32 1.0, %v2398_v49 }
 0x278   : > { %2401 = vrcp.f32 %v1634_v40  ;;  %v1635_v42 = vadd.f32 1.0, %v2400_v14 }
 0x279   : > { %2403 = vrcp.f32 %v1636_v48 }
 0x27a   : > { %2405 = vrcp.f32 %v1635_v42 }
 0x27b   : > { %2407 = vrcp.f32 %v1637_v41 }
 0x282   : > { %v2402_v27 = vpop.eup %2401 }
 0x283   : > { %v2404_v43 = vpop.eup %2403  ;;  %v1698_v44 = vmul.f32 %v2402_v27, %v1496_v15 }
 0x284   : > { %v2406_v45 = vpop.eup %2405  ;;  %v1700_v30 = vmul.f32 %v2404_v43, %v1504_v7 }
 0x285   : > { %v1729_v46 = vadd.f32 %v1728_v10, %v1698_v44  ;;  %v1699_v47 = vmul.f32 %v2406_v45, %v1499_v24  ;;  %v2408_v50 = vpop.eup %2407 }
 0x286   : > { %v1701_v51 = vmul.f32 %v2408_v50, %v1507_v19 }
 0x287   : > { %v1730_v60 = vadd.f32 %v1729_v46, %v1699_v47 }
 0x289   : > { %v1731_v52 = vadd.f32 %v1730_v60, %v1700_v30 }
 0x28b   : > { %v1732_v53 = vadd.f32 %v1731_v52, %v1701_v51 }
 0x28d   : > { %v1733_v54 = vrot.slane %v1732_v53, 4 }
 0x28f   : > { %v1734_v55 = vadd.f32 %v1733_v54, %v1732_v53 }
 0x291   : > { %v1735_v57 = vrot.slane %v1734_v55, 2 }
 0x293   : > { %v1736_v58 = vadd.f32 %v1735_v57, %v1734_v55 }
 0x295   : > { %v1737_v59 = vrot.slane %v1736_v58, 1 }
 0x297   : > { %v1738_v61 = vadd.f32 %v1737_v59, %v1736_v58 }
 0x299   : > { %v1739_v62 = vmul.f32 0.00390625, %v1738_v61 }
 0x29b   : > { %v1740_v9 = vpack.c.bf16 %v1739_v62, %v1739_v62 }
 0x29d   : > { %2175 = vmatmul.mubr.bf16.vlgmr.msra.gmra.mrb[0].mxu1 %v1740_v9 }
 0x370   : > { %v1840_v56 = vpop.f32.mrb[0].mxu1 }
 0x371   : > { %v1841_v2 = vadd.f32 %v1840_v56, %v1757_v63  ;;  %v2176_v4 = vpop.f32.mrb[1].mxu1 }
 0x372   : > { %v1843_v5 = vpop.f32.mrb[2].mxu1 }
 0x373   : > { %v2177_v6 = vpop.f32.mrb[3].mxu1  ;;  %v1848_v29 = vsel %vm1847_vm13, %v1841_v2, -inf  ;;  %1846 = vst [vmem:[%s274_s14] sm:$0x1] %v1841_v2 }
 0x374   : > { %1849 = vmax.xlane.f32.xlu0 %v1848_v29 }
 0x401   : > { %v1850_v7 = vpop.xlane.xlu0 %1849 }
 0x402   : > { %v1851_v8 = vsub.f32 %v1841_v2, %v1850_v7  ;;  %vm1862_vm14 = vcmp.eq.f32.partialorder %v1841_v2, %v1850_v7 }
 0x403   : > { %v1863_v13 = vsel %vm1862_vm14, %v1861_v11, 128 }
 0x404   : > { %v1852_v15 = vmul.f32 1.442695, %v1851_v8  ;;  %v1864_v12 = vsel %vm1847_vm13, %v1863_v13, 2147483647 }
 0x405   : > { %v1866_v16 = vshra.s32 %v1864_v12, 16  ;;  %v1865_v20 = vand.u32 65535, %v1864_v12 }
 0x406   : > { %2409 = vpow2.f32 %v1852_v15 }
 0x407   : > { %v1868_v17 = vcvt.s32.f32 %v1866_v16  ;;  %v1867_v22 = vcvt.s32.f32 %v1865_v20 }
 0x409   : > { %1869 = vmin.xlane.f32.xlu1 %v1868_v17 }
 0x410   : > { %v2410_v18 = vpop.eup %2409 }
 0x411   : > { %v1854_v19 = vsel %vm1847_vm13, %v2410_v18, 0.0 }
 0x412   : > { %1855 = vadd.xlane.f32.xlu0 %v1854_v19 }
 0x496   : > { %v3199_v21 = vpop.xlane.xlu1 %1869 }
 0x497   : > { %vm1871_vm15 = vcmp.eq.f32.partialorder %v1868_v17, %v3199_v21 }
 0x498   : > { %v1872_v24 = vsel %vm1871_vm15, %v1867_v22, inf }
 0x499   : > { %1873 = vmin.xlane.f32.xlu0 %v1872_v24 }
 0x49f   : > { %v1856_v25 = vpop.xlane.xlu0 %1855 }
 0x4a0   : > { %2411 = vrcp.f32 %v1856_v25 }
 0x4aa   : > { %v2412_v26 = vpop.eup %2411 }
 0x4ab   : > { %v1858_v3 = vmul.f32 %v2412_v26, %v2410_v18 }
 0x4ac   : > { %2426 = shalt.err (!%p2423_p3)
}
 0x4ad   : > { %s2427_s9 = scalar_lea.hbm %s3208_s17, 16  ;;  %s2431_s29 = scalar_lea.hbm %s3281_s5, 32 }
 0x4ae   : > { %p2428_p4 = scmp.ne.s32.totalorder %s3208_s17, %s2427_s9  ;;  %p2432_p9 = scmp.lt.u32.totalorder %s3208_s17, %s3281_s5 }
 0x4af   : > { %p2433_p10 = scmp.lt.u32.totalorder %s2431_s29, %s2427_s9  ;;  %p2435_p12 = scmp.lt.u32.totalorder %s2427_s9, %s3208_s17 }
 0x4b0   : > { %p2429_p7 = pnand %p2428_p4, %p2599_p5 }
 0x4b1   : > { %p2434_p11 = por %p2433_p10, %p2432_p9 }
 0x4b2   : > { %p2430_p8 = pneg %p2429_p7 }
 0x4b3   : > { %p2436_p13 = por %p2435_p12, %p2434_p11 }
 0x4b5   : > { %p2437_p0 = pnand %p2436_p13, %p2430_p8 }
 0x4b7   : > { %2440 = shalt.err (!%p2437_p0)
}
 0x4b8   : > { %2180 = dma.vmem_to_hbm [thread:$0]  (%p2599_p5), %s1902_s16, 16, %s3208_s17, %s1882_s18  }
 0x4b9   : > { %s280_s19 = scalar_lea.vmem [#allocation4], %s3190_s22  ;;  %s3234_s23 = scalar_lea.hbm %s3282_s6, %s2088_s15 }
 0x4ba   : > { %1859 = vst [vmem:[%s280_s19] sm:$0x1] %v1858_v3  ;;  %s1914_s9 = sshll.u32 %s280_s19, 4  ;;  %s1886_s29 = scalar_lea.sflag [#allocation5], %s3190_s22  ;;  %s1915_s9 = int_to_ptr.vmem [resolvable:$true] %s1914_s9 }
 0x4bb   : > { %s2441_s20 = scalar_lea.vmem %s1915_s9, 16  ;;  %s2520_s21 = smov [#allocation4]  }
 0x4bc   : > { %p2442_p1 = scmp.ne.s32.totalorder %s1915_s9, %s2441_s20  ;;  %s2445_s0 = sshll.u32 %s2520_s21, 4  ;;  %s2446_s0 = int_to_ptr.vmem [resolvable:$false] %s2445_s0 }
 0x4bd   : > { %s2447_s16 = scalar_lea.vmem %s2446_s0, 32  ;;  %p2448_p4 = scmp.lt.s32.totalorder %s1915_s9, %s2446_s0 }
 0x4be   : > { %p2443_p2 = pnand %p2442_p1, %p2599_p5  ;;  %p2449_p7 = scmp.lt.s32.totalorder %s2447_s16, %s2441_s20 }
 0x4c0   : > { %p2444_p3 = pneg %p2443_p2  ;;  %p2450_p8 = por %p2449_p7, %p2448_p4 }
 0x4c2   : > { %p2451_p9 = pnand %p2450_p8, %p2444_p3 }
 0x4c4   : > { %2454 = shalt.err (!%p2451_p9)
}
 0x4c5   : > { %s2455_s28 = scalar_lea.hbm %s3234_s23, 16  ;;  %s2459_s17 = scalar_lea.hbm %s3282_s6, 32 }
 0x4c6   : > { %p2456_p10 = scmp.ne.s32.totalorder %s3234_s23, %s2455_s28  ;;  %p2460_p13 = scmp.lt.u32.totalorder %s3234_s23, %s3282_s6 }
 0x4c7   : > { %p2461_p0 = scmp.lt.u32.totalorder %s2459_s17, %s2455_s28  ;;  %p2463_p2 = scmp.lt.u32.totalorder %s2455_s28, %s3234_s23 }
 0x4c8   : > { %p2457_p11 = pnand %p2456_p10, %p2599_p5 }
 0x4c9   : > { %p2462_p1 = por %p2461_p0, %p2460_p13 }
 0x4ca   : > { %p2458_p12 = pneg %p2457_p11 }
 0x4cb   : > { %p2464_p3 = por %p2463_p2, %p2462_p1 }
 0x4cd   : > { %p2465_p4 = pnand %p2464_p3, %p2458_p12 }
 0x4cf   : > { %2468 = shalt.err (!%p2465_p4)
}
 0x4d0   : > { %2181 = dma.vmem_to_hbm [thread:$0]  (%p2599_p5), %s1915_s9, 16, %s3234_s23, %s1886_s29   ;;  %v1876_v31 = vcvt.f32.s32 %v3199_v21  ;;  %vm1879_vm0 = vcmask 0  }
 0x4d1   : > { %s293_s14 = scalar_lea.vmem %s3283_s7, %s2611_s13 }
 0x4d2   : > { %v1877_v33 = vshll.u32 %v1876_v31, 16 }
 0x526   : > { %v1874_v1 = vpop.xlane.xlu0 %1873 }
 0x527   : > { %v1875_v32 = vcvt.f32.s32 %v1874_v1 }
 0x529   : > { %v1878_v34 = vadd.s32 %v1877_v33, %v1875_v32 }
 0x52b   : > { %1880 = vst.msk [vmem:[%s293_s14] sm:$0x1] %vm1879_vm0, %v1878_v34 }
 0x52c PF: > { %p2191_p7 = scmp.ge.s32.totalorder %s2507_s27, 2  ;;  %s1929_s11 = sand.u32 1, %s2495_s24  }
 0x52d   : > { %s1930_s23 = scalar_lea.sflag [#allocation3], %s1929_s11 }
 0x52e   : > { %p2185_p5 = pnand %p2191_p7, %p2603_p6 }
 0x530   : > { %2486 = dma.done.wait (!%p2185_p5), %s1930_s23, 16  }
 0x531   : > { %2488 = vsyncadd (!%p2185_p5), %s1930_s23, 4294967280  ;;  %s1938_s9 = scalar_lea.sflag [#allocation5], %s1929_s11 }
 0x532   : > { %2490 = dma.done.wait (!%p2185_p5), %s1938_s9, 16  }
 0x533   : > { %2492 = vsyncadd (!%p2185_p5), %s1938_s9, 4294967280  ;;  %p21_p8 = scmp.ge.s32.totalorder %s2586_s30, 4   ;;  %s3288_s24 = smov %s2499_s25 }
 0x534   : > { %s3289_s25 = smov %s2503_s26  ;;  %s3290_s26 = smov %s2597_s10 }
 0x535   : > { %s3291_s27 = smov %s2586_s30  ;;  %23 = sbr.rel (!%p21_p8) target bundleno = 7 (0x7), region = 104 }
 0x53c   :  { %1948 = vsyncpa [#allocation3], 1 }
 0x53d   :  { %1950 = vsyncpa [#allocation3 + $0x1], 1 }
 0x53e   :  { %1951 = vsyncpa [#allocation5], 1 }
 0x53f   :  { %1953 = vsyncpa [#allocation5 + $0x1], 1 }

</bundles_post_ra>
